<compile_context>
chip_gen: v7x
topology: tpu7x:2x2x1
jax: 0.10.0
libtpu: 0.0.40
codegen_flags: <defaults>
</compile_context>

<pallas_src>
import math

import jax
import jax.numpy as jnp
from jax.experimental import pallas as pl
from jax.experimental.pallas import tpu as pltpu

# ----------------------------- config ---------------------------------------
VOCAB = 128
MAX_POS = 32
HIDDEN = 128
N_HEADS = 4
HEAD_DIM = HIDDEN // N_HEADS
INTERMEDIATE = 256
N_LAYERS = 2
N_CLASSES = 3
CLS_PAD = 128          # classifier output padded to a full 128-lane slab
LN_EPS = 1e-12


# ----------------------------- kernel helpers --------------------------------
def _layernorm(x, g, b):
    mu = jnp.mean(x, axis=-1, keepdims=True)
    var = jnp.mean((x - mu) ** 2, axis=-1, keepdims=True)
    return (x - mu) * jax.lax.rsqrt(var + LN_EPS) * g + b


# ----------------------------- fused Pallas kernel ---------------------------
def _bert_kernel(x_ref, bias_ref, eg_ref, eb_ref,
                 wqkv_ref, bqkv_ref, wo_ref, bo_ref, ln1g_ref, ln1b_ref,
                 w1_ref, b1_ref, w2_ref, b2_ref, ln2g_ref, ln2b_ref,
                 wp_ref, bp_ref, wc_ref, bc_ref, out_ref):
    # x: (S, H) summed embeddings for one batch element.
    h = _layernorm(x_ref[...].astype(jnp.float32), eg_ref[...], eb_ref[...])
    attn_bias = bias_ref[...]                      # (1, S): 0 keep, -1e9 pad
    scale = 1.0 / math.sqrt(HEAD_DIM)

    for l in range(N_LAYERS):                      # static, fully unrolled
        # ---------- attention: fused QKV matmul, all heads in-kernel ----------
        qkv = jnp.dot(h.astype(jnp.bfloat16), wqkv_ref[l],
                      preferred_element_type=jnp.float32) + bqkv_ref[l]
        q = qkv[:, 0:HIDDEN] * scale               # fold 1/sqrt(Dh) into q
        k = qkv[:, HIDDEN:2 * HIDDEN]
        v = qkv[:, 2 * HIDDEN:3 * HIDDEN]

        ctx_heads = []
        for hd in range(N_HEADS):                  # static unrolled head loop
            lo, hi = hd * HEAD_DIM, (hd + 1) * HEAD_DIM
            qh, kh, vh = q[:, lo:hi], k[:, lo:hi], v[:, lo:hi]
            # s = qh @ kh^T   (contract head_dim)
            s = jax.lax.dot_general(qh, kh, (((1,), (1,)), ((), ())),
                                    preferred_element_type=jnp.float32)
            s = s + attn_bias
            s = s - jnp.max(s, axis=-1, keepdims=True)
            p = jnp.exp(s)
            p = p * pl.reciprocal(jnp.sum(p, axis=-1, keepdims=True),
                                  approx=True)
            ctx_heads.append(jnp.dot(p, vh, preferred_element_type=jnp.float32))
        ctx = jnp.concatenate(ctx_heads, axis=-1)  # (S, H) lane-dense

        attn_out = jnp.dot(ctx.astype(jnp.bfloat16), wo_ref[l],
                           preferred_element_type=jnp.float32) + bo_ref[l]
        h = _layernorm(attn_out + h, ln1g_ref[l], ln1b_ref[l])

        # ---------- feed-forward ----------
        # TODO(synk): HF BERT uses the exact erf GELU; tanh approximation here.
        ffn = jax.nn.gelu(
            jnp.dot(h.astype(jnp.bfloat16), w1_ref[l],
                    preferred_element_type=jnp.float32) + b1_ref[l],
            approximate=True)
        ffn = jnp.dot(ffn.astype(jnp.bfloat16), w2_ref[l],
                      preferred_element_type=jnp.float32) + b2_ref[l]
        h = _layernorm(ffn + h, ln2g_ref[l], ln2b_ref[l])

    # ---------- pooler (tanh on [CLS]) + dropout(eval=id) + classifier --------
    cls = h[0:1, :]
    pooled = jnp.tanh(jnp.dot(cls.astype(jnp.bfloat16), wp_ref[...],
                              preferred_element_type=jnp.float32) + bp_ref[...])
    # TODO(synk): train-mode nn.Dropout(p=0.3) would use pltpu.prng_seed +
    # pltpu.prng_random_bits for the keep mask; eval semantics are identity.
    out_ref[...] = (jnp.dot(pooled.astype(jnp.bfloat16), wc_ref[...],
                            preferred_element_type=jnp.float32) + bc_ref[...])


# ----------------------------- pallas_call wrapper ---------------------------
def _fused_forward(emb, mask_bias, p):
    B, S, H = emb.shape

    def full(a):
        nd = a.ndim
        return pl.BlockSpec(a.shape, lambda b, _nd=nd: (0,) * _nd)

    return pl.pallas_call(
        _bert_kernel,
        out_shape=jax.ShapeDtypeStruct((B, 1, CLS_PAD), jnp.float32),
        grid=(B,),
        in_specs=[
            pl.BlockSpec((None, S, H), lambda b: (b, 0, 0)),   # embeddings
            pl.BlockSpec((None, 1, S), lambda b: (b, 0, 0)),   # mask bias
            full(p["emb_ln_g"]), full(p["emb_ln_b"]),
            full(p["wqkv"]), full(p["bqkv"]),
            full(p["wo"]), full(p["bo"]),
            full(p["ln1_g"]), full(p["ln1_b"]),
            full(p["w1"]), full(p["b1"]),
            full(p["w2"]), full(p["b2"]),
            full(p["ln2_g"]), full(p["ln2_b"]),
            full(p["wp"]), full(p["bp"]),
            full(p["wcls"]), full(p["bcls"]),
        ],
        out_specs=pl.BlockSpec((None, 1, CLS_PAD), lambda b: (b, 0, 0)),
        compiler_params=pltpu.CompilerParams(
            dimension_semantics=("parallel",)),   # v7x: one batch elem per TC
    )(emb, mask_bias,
      p["emb_ln_g"], p["emb_ln_b"],
      p["wqkv"], p["bqkv"], p["wo"], p["bo"], p["ln1_g"], p["ln1_b"],
      p["w1"], p["b1"], p["w2"], p["b2"], p["ln2_g"], p["ln2_b"],
      p["wp"], p["bp"], p["wcls"], p["bcls"])


# ----------------------------- parameters ------------------------------------
def init_params(key):
    keys = iter(jax.random.split(key, 16))

    def nrm(shape, scale=0.02):
        return scale * jax.random.normal(next(keys), shape, dtype=jnp.float32)

    wcls = jnp.zeros((HIDDEN, CLS_PAD), jnp.float32)
    wcls = wcls.at[:, :N_CLASSES].set(nrm((HIDDEN, N_CLASSES)))

    return {
        "word_emb": nrm((VOCAB, HIDDEN)),
        "pos_emb": nrm((MAX_POS, HIDDEN)),
        "type_emb": nrm((2, HIDDEN)),
        "emb_ln_g": jnp.ones((1, HIDDEN), jnp.float32),
        "emb_ln_b": jnp.zeros((1, HIDDEN), jnp.float32),
        # per-layer weights stacked on a leading layer axis; MXU operands bf16
        "wqkv": nrm((N_LAYERS, HIDDEN, 3 * HIDDEN)).astype(jnp.bfloat16),
        "bqkv": jnp.zeros((N_LAYERS, 1, 3 * HIDDEN), jnp.float32),
        "wo": nrm((N_LAYERS, HIDDEN, HIDDEN)).astype(jnp.bfloat16),
        "bo": jnp.zeros((N_LAYERS, 1, HIDDEN), jnp.float32),
        "ln1_g": jnp.ones((N_LAYERS, 1, HIDDEN), jnp.float32),
        "ln1_b": jnp.zeros((N_LAYERS, 1, HIDDEN), jnp.float32),
        "w1": nrm((N_LAYERS, HIDDEN, INTERMEDIATE)).astype(jnp.bfloat16),
        "b1": jnp.zeros((N_LAYERS, 1, INTERMEDIATE), jnp.float32),
        "w2": nrm((N_LAYERS, INTERMEDIATE, HIDDEN)).astype(jnp.bfloat16),
        "b2": jnp.zeros((N_LAYERS, 1, HIDDEN), jnp.float32),
        "ln2_g": jnp.ones((N_LAYERS, 1, HIDDEN), jnp.float32),
        "ln2_b": jnp.zeros((N_LAYERS, 1, HIDDEN), jnp.float32),
        "wp": nrm((HIDDEN, HIDDEN)).astype(jnp.bfloat16),        # pooler dense
        "bp": jnp.zeros((1, HIDDEN), jnp.float32),
        "wcls": wcls.astype(jnp.bfloat16),                        # self.out
        "bcls": jnp.zeros((1, CLS_PAD), jnp.float32),
    }


# ----------------------------- forward ---------------------------------------
def rate_classifier_forward(params, input_ids, attention_mask):
    """Equivalent of RateClassifier.forward(input_ids, attention_mask)."""
    B, S = input_ids.shape
    # Embedding gathers are glue in plain JAX; everything else is one kernel.
    word = jnp.take(params["word_emb"], input_ids, axis=0)            # (B,S,H)
    pos = params["pos_emb"][:S][None, :, :]                           # (1,S,H)
    typ = params["type_emb"][0][None, None, :]                        # (1,1,H)
    emb = (word + pos + typ).astype(jnp.float32)                      # (B,S,H)
    mask_bias = (1.0 - attention_mask.astype(jnp.float32))[:, None, :] * (-1e9)
    logits_pad = _fused_forward(emb, mask_bias, params)               # (B,1,128)
    return logits_pad[:, 0, :N_CLASSES]


# ----------------------------- main ------------------------------------------
if __name__ == "__main__":
    key = jax.random.PRNGKey(0)
    pkey, ikey = jax.random.split(key)
    params = init_params(pkey)

    B, S = 2, 8
    input_ids = jax.random.randint(ikey, (B, S), 0, VOCAB, dtype=jnp.int32)
    attention_mask = jnp.array(
        [[1, 1, 1, 1, 1, 1, 1, 1],
         [1, 1, 1, 1, 1, 1, 0, 0]], dtype=jnp.int32)

    forward = jax.jit(rate_classifier_forward)
    logits = forward(params, input_ids, attention_mask)
    logits = jax.block_until_ready(logits)
    assert logits.shape == (B, N_CLASSES)
    assert bool(jnp.all(jnp.isfinite(logits)))
    print("KERNEL_OK")
</pallas_src>

<mosaic_0001>
module attributes {stable_mosaic.version = 11 : i64} {
  func.func @_bert_kernel(%arg0: i32, %arg1: memref<1x8x128xf32, #tpu.memory_space<vmem>>, %arg2: memref<1x1x8xf32, #tpu.memory_space<vmem>>, %arg3: memref<1x128xf32, #tpu.memory_space<vmem>>, %arg4: memref<1x128xf32, #tpu.memory_space<vmem>>, %arg5: memref<2x128x384xbf16, #tpu.memory_space<vmem>>, %arg6: memref<2x1x384xf32, #tpu.memory_space<vmem>>, %arg7: memref<2x128x128xbf16, #tpu.memory_space<vmem>>, %arg8: memref<2x1x128xf32, #tpu.memory_space<vmem>>, %arg9: memref<2x1x128xf32, #tpu.memory_space<vmem>>, %arg10: memref<2x1x128xf32, #tpu.memory_space<vmem>>, %arg11: memref<2x128x256xbf16, #tpu.memory_space<vmem>>, %arg12: memref<2x1x256xf32, #tpu.memory_space<vmem>>, %arg13: memref<2x256x128xbf16, #tpu.memory_space<vmem>>, %arg14: memref<2x1x128xf32, #tpu.memory_space<vmem>>, %arg15: memref<2x1x128xf32, #tpu.memory_space<vmem>>, %arg16: memref<2x1x128xf32, #tpu.memory_space<vmem>>, %arg17: memref<128x128xbf16, #tpu.memory_space<vmem>>, %arg18: memref<1x128xf32, #tpu.memory_space<vmem>>, %arg19: memref<128x128xbf16, #tpu.memory_space<vmem>>, %arg20: memref<1x128xf32, #tpu.memory_space<vmem>>, %arg21: memref<1x1x128xf32, #tpu.memory_space<vmem>>) attributes {dimension_semantics = [#tpu.dimension_semantics<parallel>], iteration_bounds = array<i64: 2>, scalar_prefetch = 0 : i64, scratch_operands = 0 : i64, tpu.core_type = #tpu.core_type<tc>, window_params = [{transform_indices = @transform_0, window_bounds = array<i64: 1, 8, 128>}, {transform_indices = @transform_1, window_bounds = array<i64: 1, 1, 8>}, {pipeline_mode = #tpu.pipeline_mode<synchronous>, transform_indices = @transform_2, window_bounds = array<i64: 1, 128>}, {pipeline_mode = #tpu.pipeline_mode<synchronous>, transform_indices = @transform_3, window_bounds = array<i64: 1, 128>}, {pipeline_mode = #tpu.pipeline_mode<synchronous>, transform_indices = @transform_4, window_bounds = array<i64: 2, 128, 384>}, {pipeline_mode = #tpu.pipeline_mode<synchronous>, transform_indices = @transform_5, window_bounds = array<i64: 2, 1, 384>}, {pipeline_mode = #tpu.pipeline_mode<synchronous>, transform_indices = @transform_6, window_bounds = array<i64: 2, 128, 128>}, {pipeline_mode = #tpu.pipeline_mode<synchronous>, transform_indices = @transform_7, window_bounds = array<i64: 2, 1, 128>}, {pipeline_mode = #tpu.pipeline_mode<synchronous>, transform_indices = @transform_8, window_bounds = array<i64: 2, 1, 128>}, {pipeline_mode = #tpu.pipeline_mode<synchronous>, transform_indices = @transform_9, window_bounds = array<i64: 2, 1, 128>}, {pipeline_mode = #tpu.pipeline_mode<synchronous>, transform_indices = @transform_10, window_bounds = array<i64: 2, 128, 256>}, {pipeline_mode = #tpu.pipeline_mode<synchronous>, transform_indices = @transform_11, window_bounds = array<i64: 2, 1, 256>}, {pipeline_mode = #tpu.pipeline_mode<synchronous>, transform_indices = @transform_12, window_bounds = array<i64: 2, 256, 128>}, {pipeline_mode = #tpu.pipeline_mode<synchronous>, transform_indices = @transform_13, window_bounds = array<i64: 2, 1, 128>}, {pipeline_mode = #tpu.pipeline_mode<synchronous>, transform_indices = @transform_14, window_bounds = array<i64: 2, 1, 128>}, {pipeline_mode = #tpu.pipeline_mode<synchronous>, transform_indices = @transform_15, window_bounds = array<i64: 2, 1, 128>}, {pipeline_mode = #tpu.pipeline_mode<synchronous>, transform_indices = @transform_16, window_bounds = array<i64: 128, 128>}, {pipeline_mode = #tpu.pipeline_mode<synchronous>, transform_indices = @transform_17, window_bounds = array<i64: 1, 128>}, {pipeline_mode = #tpu.pipeline_mode<synchronous>, transform_indices = @transform_18, window_bounds = array<i64: 128, 128>}, {pipeline_mode = #tpu.pipeline_mode<synchronous>, transform_indices = @transform_19, window_bounds = array<i64: 1, 128>}, {transform_indices = @transform_20, window_bounds = array<i64: 1, 1, 128>}]} {
    %c0 = arith.constant 0 : index
    %c0_0 = arith.constant 0 : index
    %c0_1 = arith.constant 0 : index
    %0 = vector.load %arg1[%c0, %c0_0, %c0_1] : memref<1x8x128xf32, #tpu.memory_space<vmem>>, vector<1x8x128xf32>
    %1 = vector.shape_cast %0 : vector<1x8x128xf32> to vector<8x128xf32>
    %c0_2 = arith.constant 0 : index
    %c0_3 = arith.constant 0 : index
    %2 = vector.load %arg3[%c0_2, %c0_3] : memref<1x128xf32, #tpu.memory_space<vmem>>, vector<1x128xf32>
    %c0_4 = arith.constant 0 : index
    %c0_5 = arith.constant 0 : index
    %3 = vector.load %arg4[%c0_4, %c0_5] : memref<1x128xf32, #tpu.memory_space<vmem>>, vector<1x128xf32>
    %cst = arith.constant dense<0.000000e+00> : vector<8xf32>
    %4 = vector.multi_reduction <add>, %1, %cst [1] : vector<8x128xf32> to vector<8xf32>
    %5 = vector.shape_cast %4 : vector<8xf32> to vector<8x1xf32>
    %cst_6 = arith.constant 1.280000e+02 : f32
    %6 = vector.broadcast %cst_6 : f32 to vector<8x1xf32>
    %7 = arith.divf %5, %6 : vector<8x1xf32>
    %8 = vector.broadcast %7 : vector<8x1xf32> to vector<8x128xf32>
    %9 = arith.subf %1, %8 : vector<8x128xf32>
    %10 = arith.mulf %9, %9 : vector<8x128xf32>
    %cst_7 = arith.constant dense<0.000000e+00> : vector<8xf32>
    %11 = vector.multi_reduction <add>, %10, %cst_7 [1] : vector<8x128xf32> to vector<8xf32>
    %12 = vector.shape_cast %11 : vector<8xf32> to vector<8x1xf32>
    %cst_8 = arith.constant 1.280000e+02 : f32
    %13 = vector.broadcast %cst_8 : f32 to vector<8x1xf32>
    %14 = arith.divf %12, %13 : vector<8x1xf32>
    %15 = vector.broadcast %7 : vector<8x1xf32> to vector<8x128xf32>
    %16 = arith.subf %1, %15 : vector<8x128xf32>
    %cst_9 = arith.constant 9.99999996E-13 : f32
    %17 = vector.broadcast %cst_9 : f32 to vector<8x1xf32>
    %18 = arith.addf %14, %17 : vector<8x1xf32>
    %19 = math.rsqrt %18 : vector<8x1xf32>
    %20 = vector.broadcast %19 : vector<8x1xf32> to vector<8x128xf32>
    %21 = arith.mulf %16, %20 : vector<8x128xf32>
    %22 = vector.broadcast %2 : vector<1x128xf32> to vector<8x128xf32>
    %23 = arith.mulf %21, %22 : vector<8x128xf32>
    %24 = vector.broadcast %3 : vector<1x128xf32> to vector<8x128xf32>
    %25 = arith.addf %23, %24 : vector<8x128xf32>
    %c0_10 = arith.constant 0 : index
    %c0_11 = arith.constant 0 : index
    %c0_12 = arith.constant 0 : index
    %26 = vector.load %arg2[%c0_10, %c0_11, %c0_12] : memref<1x1x8xf32, #tpu.memory_space<vmem>>, vector<1x1x8xf32>
    %27 = vector.shape_cast %26 : vector<1x1x8xf32> to vector<1x8xf32>
    %28 = arith.truncf %25 : vector<8x128xf32> to vector<8x128xbf16>
    %c0_13 = arith.constant 0 : index
    %c0_14 = arith.constant 0 : index
    %c0_15 = arith.constant 0 : index
    %29 = vector.load %arg5[%c0_13, %c0_14, %c0_15] : memref<2x128x384xbf16, #tpu.memory_space<vmem>>, vector<1x128x384xbf16>
    %30 = vector.shape_cast %29 : vector<1x128x384xbf16> to vector<128x384xbf16>
    %cst_16 = arith.constant dense<0.000000e+00> : vector<8x384xf32>
    %31 = tpu.matmul %28, %30, %cst_16 {dimension_numbers = #tpu.dot_dimension_numbers<[1], [0], [0], [1], [0, 0, 1, 1], [], []>} : vector<8x128xbf16>, vector<128x384xbf16>, vector<8x384xf32> -> vector<8x384xf32>
    %c0_17 = arith.constant 0 : index
    %c0_18 = arith.constant 0 : index
    %c0_19 = arith.constant 0 : index
    %32 = vector.load %arg6[%c0_17, %c0_18, %c0_19] : memref<2x1x384xf32, #tpu.memory_space<vmem>>, vector<1x1x384xf32>
    %33 = vector.shape_cast %32 : vector<1x1x384xf32> to vector<1x384xf32>
    %34 = vector.broadcast %33 : vector<1x384xf32> to vector<8x384xf32>
    %35 = arith.addf %31, %34 : vector<8x384xf32>
    %36 = vector.extract_strided_slice %35 {offsets = [0, 0], sizes = [8, 128], strides = [1, 1]} : vector<8x384xf32> to vector<8x128xf32>
    %cst_20 = arith.constant 0.176776692 : f32
    %37 = vector.broadcast %cst_20 : f32 to vector<8x128xf32>
    %38 = arith.mulf %36, %37 : vector<8x128xf32>
    %39 = vector.extract_strided_slice %35 {offsets = [0, 128], sizes = [8, 128], strides = [1, 1]} : vector<8x384xf32> to vector<8x128xf32>
    %40 = vector.extract_strided_slice %35 {offsets = [0, 256], sizes = [8, 128], strides = [1, 1]} : vector<8x384xf32> to vector<8x128xf32>
    %41 = vector.extract_strided_slice %38 {offsets = [0, 0], sizes = [8, 32], strides = [1, 1]} : vector<8x128xf32> to vector<8x32xf32>
    %42 = vector.extract_strided_slice %39 {offsets = [0, 0], sizes = [8, 32], strides = [1, 1]} : vector<8x128xf32> to vector<8x32xf32>
    %43 = vector.extract_strided_slice %40 {offsets = [0, 0], sizes = [8, 32], strides = [1, 1]} : vector<8x128xf32> to vector<8x32xf32>
    %cst_21 = arith.constant dense<0.000000e+00> : vector<8x8xf32>
    %44 = tpu.matmul %41, %42, %cst_21 {dimension_numbers = #tpu.dot_dimension_numbers<[1], [1], [0], [0], [0, 0, 1, 0], [], []>} : vector<8x32xf32>, vector<8x32xf32>, vector<8x8xf32> -> vector<8x8xf32>
    %45 = vector.broadcast %27 : vector<1x8xf32> to vector<8x8xf32>
    %46 = arith.addf %44, %45 : vector<8x8xf32>
    %cst_22 = arith.constant dense<0xFF800000> : vector<8xf32>
    %47 = vector.multi_reduction <maximumf>, %46, %cst_22 [1] : vector<8x8xf32> to vector<8xf32>
    %48 = vector.shape_cast %47 : vector<8xf32> to vector<8x1xf32>
    %49 = vector.broadcast %48 : vector<8x1xf32> to vector<8x8xf32>
    %50 = arith.subf %46, %49 : vector<8x8xf32>
    %51 = math.exp %50 : vector<8x8xf32>
    %cst_23 = arith.constant dense<0.000000e+00> : vector<8xf32>
    %52 = vector.multi_reduction <add>, %51, %cst_23 [1] : vector<8x8xf32> to vector<8xf32>
    %53 = vector.shape_cast %52 : vector<8xf32> to vector<8x1xf32>
    %54 = tpu.reciprocal %53 {approx = true} : vector<8x1xf32> -> vector<8x1xf32>
    %55 = vector.broadcast %54 : vector<8x1xf32> to vector<8x8xf32>
    %56 = arith.mulf %51, %55 : vector<8x8xf32>
    %cst_24 = arith.constant dense<0.000000e+00> : vector<8x32xf32>
    %57 = tpu.matmul %56, %43, %cst_24 {dimension_numbers = #tpu.dot_dimension_numbers<[1], [0], [0], [1], [0, 0, 1, 1], [], []>} : vector<8x8xf32>, vector<8x32xf32>, vector<8x32xf32> -> vector<8x32xf32>
    %58 = vector.extract_strided_slice %38 {offsets = [0, 32], sizes = [8, 32], strides = [1, 1]} : vector<8x128xf32> to vector<8x32xf32>
    %59 = vector.extract_strided_slice %39 {offsets = [0, 32], sizes = [8, 32], strides = [1, 1]} : vector<8x128xf32> to vector<8x32xf32>
    %60 = vector.extract_strided_slice %40 {offsets = [0, 32], sizes = [8, 32], strides = [1, 1]} : vector<8x128xf32> to vector<8x32xf32>
    %cst_25 = arith.constant dense<0.000000e+00> : vector<8x8xf32>
    %61 = tpu.matmul %58, %59, %cst_25 {dimension_numbers = #tpu.dot_dimension_numbers<[1], [1], [0], [0], [0, 0, 1, 0], [], []>} : vector<8x32xf32>, vector<8x32xf32>, vector<8x8xf32> -> vector<8x8xf32>
    %62 = vector.broadcast %27 : vector<1x8xf32> to vector<8x8xf32>
    %63 = arith.addf %61, %62 : vector<8x8xf32>
    %cst_26 = arith.constant dense<0xFF800000> : vector<8xf32>
    %64 = vector.multi_reduction <maximumf>, %63, %cst_26 [1] : vector<8x8xf32> to vector<8xf32>
    %65 = vector.shape_cast %64 : vector<8xf32> to vector<8x1xf32>
    %66 = vector.broadcast %65 : vector<8x1xf32> to vector<8x8xf32>
    %67 = arith.subf %63, %66 : vector<8x8xf32>
    %68 = math.exp %67 : vector<8x8xf32>
    %cst_27 = arith.constant dense<0.000000e+00> : vector<8xf32>
    %69 = vector.multi_reduction <add>, %68, %cst_27 [1] : vector<8x8xf32> to vector<8xf32>
    %70 = vector.shape_cast %69 : vector<8xf32> to vector<8x1xf32>
    %71 = tpu.reciprocal %70 {approx = true} : vector<8x1xf32> -> vector<8x1xf32>
    %72 = vector.broadcast %71 : vector<8x1xf32> to vector<8x8xf32>
    %73 = arith.mulf %68, %72 : vector<8x8xf32>
    %cst_28 = arith.constant dense<0.000000e+00> : vector<8x32xf32>
    %74 = tpu.matmul %73, %60, %cst_28 {dimension_numbers = #tpu.dot_dimension_numbers<[1], [0], [0], [1], [0, 0, 1, 1], [], []>} : vector<8x8xf32>, vector<8x32xf32>, vector<8x32xf32> -> vector<8x32xf32>
    %75 = vector.extract_strided_slice %38 {offsets = [0, 64], sizes = [8, 32], strides = [1, 1]} : vector<8x128xf32> to vector<8x32xf32>
    %76 = vector.extract_strided_slice %39 {offsets = [0, 64], sizes = [8, 32], strides = [1, 1]} : vector<8x128xf32> to vector<8x32xf32>
    %77 = vector.extract_strided_slice %40 {offsets = [0, 64], sizes = [8, 32], strides = [1, 1]} : vector<8x128xf32> to vector<8x32xf32>
    %cst_29 = arith.constant dense<0.000000e+00> : vector<8x8xf32>
    %78 = tpu.matmul %75, %76, %cst_29 {dimension_numbers = #tpu.dot_dimension_numbers<[1], [1], [0], [0], [0, 0, 1, 0], [], []>} : vector<8x32xf32>, vector<8x32xf32>, vector<8x8xf32> -> vector<8x8xf32>
    %79 = vector.broadcast %27 : vector<1x8xf32> to vector<8x8xf32>
    %80 = arith.addf %78, %79 : vector<8x8xf32>
    %cst_30 = arith.constant dense<0xFF800000> : vector<8xf32>
    %81 = vector.multi_reduction <maximumf>, %80, %cst_30 [1] : vector<8x8xf32> to vector<8xf32>
    %82 = vector.shape_cast %81 : vector<8xf32> to vector<8x1xf32>
    %83 = vector.broadcast %82 : vector<8x1xf32> to vector<8x8xf32>
    %84 = arith.subf %80, %83 : vector<8x8xf32>
    %85 = math.exp %84 : vector<8x8xf32>
    %cst_31 = arith.constant dense<0.000000e+00> : vector<8xf32>
    %86 = vector.multi_reduction <add>, %85, %cst_31 [1] : vector<8x8xf32> to vector<8xf32>
    %87 = vector.shape_cast %86 : vector<8xf32> to vector<8x1xf32>
    %88 = tpu.reciprocal %87 {approx = true} : vector<8x1xf32> -> vector<8x1xf32>
    %89 = vector.broadcast %88 : vector<8x1xf32> to vector<8x8xf32>
    %90 = arith.mulf %85, %89 : vector<8x8xf32>
    %cst_32 = arith.constant dense<0.000000e+00> : vector<8x32xf32>
    %91 = tpu.matmul %90, %77, %cst_32 {dimension_numbers = #tpu.dot_dimension_numbers<[1], [0], [0], [1], [0, 0, 1, 1], [], []>} : vector<8x8xf32>, vector<8x32xf32>, vector<8x32xf32> -> vector<8x32xf32>
    %92 = vector.extract_strided_slice %38 {offsets = [0, 96], sizes = [8, 32], strides = [1, 1]} : vector<8x128xf32> to vector<8x32xf32>
    %93 = vector.extract_strided_slice %39 {offsets = [0, 96], sizes = [8, 32], strides = [1, 1]} : vector<8x128xf32> to vector<8x32xf32>
    %94 = vector.extract_strided_slice %40 {offsets = [0, 96], sizes = [8, 32], strides = [1, 1]} : vector<8x128xf32> to vector<8x32xf32>
    %cst_33 = arith.constant dense<0.000000e+00> : vector<8x8xf32>
    %95 = tpu.matmul %92, %93, %cst_33 {dimension_numbers = #tpu.dot_dimension_numbers<[1], [1], [0], [0], [0, 0, 1, 0], [], []>} : vector<8x32xf32>, vector<8x32xf32>, vector<8x8xf32> -> vector<8x8xf32>
    %96 = vector.broadcast %27 : vector<1x8xf32> to vector<8x8xf32>
    %97 = arith.addf %95, %96 : vector<8x8xf32>
    %cst_34 = arith.constant dense<0xFF800000> : vector<8xf32>
    %98 = vector.multi_reduction <maximumf>, %97, %cst_34 [1] : vector<8x8xf32> to vector<8xf32>
    %99 = vector.shape_cast %98 : vector<8xf32> to vector<8x1xf32>
    %100 = vector.broadcast %99 : vector<8x1xf32> to vector<8x8xf32>
    %101 = arith.subf %97, %100 : vector<8x8xf32>
    %102 = math.exp %101 : vector<8x8xf32>
    %cst_35 = arith.constant dense<0.000000e+00> : vector<8xf32>
    %103 = vector.multi_reduction <add>, %102, %cst_35 [1] : vector<8x8xf32> to vector<8xf32>
    %104 = vector.shape_cast %103 : vector<8xf32> to vector<8x1xf32>
    %105 = tpu.reciprocal %104 {approx = true} : vector<8x1xf32> -> vector<8x1xf32>
    %106 = vector.broadcast %105 : vector<8x1xf32> to vector<8x8xf32>
    %107 = arith.mulf %102, %106 : vector<8x8xf32>
    %cst_36 = arith.constant dense<0.000000e+00> : vector<8x32xf32>
    %108 = tpu.matmul %107, %94, %cst_36 {dimension_numbers = #tpu.dot_dimension_numbers<[1], [0], [0], [1], [0, 0, 1, 1], [], []>} : vector<8x8xf32>, vector<8x32xf32>, vector<8x32xf32> -> vector<8x32xf32>
    %109 = tpu.concatenate %57, %74, %91, %108 in 1 : vector<8x32xf32>, vector<8x32xf32>, vector<8x32xf32>, vector<8x32xf32> -> vector<8x128xf32>
    %110 = arith.truncf %109 : vector<8x128xf32> to vector<8x128xbf16>
    %c0_37 = arith.constant 0 : index
    %c0_38 = arith.constant 0 : index
    %c0_39 = arith.constant 0 : index
    %111 = vector.load %arg7[%c0_37, %c0_38, %c0_39] : memref<2x128x128xbf16, #tpu.memory_space<vmem>>, vector<1x128x128xbf16>
    %112 = vector.shape_cast %111 : vector<1x128x128xbf16> to vector<128x128xbf16>
    %cst_40 = arith.constant dense<0.000000e+00> : vector<8x128xf32>
    %113 = tpu.matmul %110, %112, %cst_40 {dimension_numbers = #tpu.dot_dimension_numbers<[1], [0], [0], [1], [0, 0, 1, 1], [], []>} : vector<8x128xbf16>, vector<128x128xbf16>, vector<8x128xf32> -> vector<8x128xf32>
    %c0_41 = arith.constant 0 : index
    %c0_42 = arith.constant 0 : index
    %c0_43 = arith.constant 0 : index
    %114 = vector.load %arg8[%c0_41, %c0_42, %c0_43] : memref<2x1x128xf32, #tpu.memory_space<vmem>>, vector<1x1x128xf32>
    %115 = vector.shape_cast %114 : vector<1x1x128xf32> to vector<1x128xf32>
    %116 = vector.broadcast %115 : vector<1x128xf32> to vector<8x128xf32>
    %117 = arith.addf %113, %116 : vector<8x128xf32>
    %118 = arith.addf %117, %25 : vector<8x128xf32>
    %c0_44 = arith.constant 0 : index
    %c0_45 = arith.constant 0 : index
    %c0_46 = arith.constant 0 : index
    %119 = vector.load %arg9[%c0_44, %c0_45, %c0_46] : memref<2x1x128xf32, #tpu.memory_space<vmem>>, vector<1x1x128xf32>
    %120 = vector.shape_cast %119 : vector<1x1x128xf32> to vector<1x128xf32>
    %c0_47 = arith.constant 0 : index
    %c0_48 = arith.constant 0 : index
    %c0_49 = arith.constant 0 : index
    %121 = vector.load %arg10[%c0_47, %c0_48, %c0_49] : memref<2x1x128xf32, #tpu.memory_space<vmem>>, vector<1x1x128xf32>
    %122 = vector.shape_cast %121 : vector<1x1x128xf32> to vector<1x128xf32>
    %cst_50 = arith.constant dense<0.000000e+00> : vector<8xf32>
    %123 = vector.multi_reduction <add>, %118, %cst_50 [1] : vector<8x128xf32> to vector<8xf32>
    %124 = vector.shape_cast %123 : vector<8xf32> to vector<8x1xf32>
    %cst_51 = arith.constant 1.280000e+02 : f32
    %125 = vector.broadcast %cst_51 : f32 to vector<8x1xf32>
    %126 = arith.divf %124, %125 : vector<8x1xf32>
    %127 = vector.broadcast %126 : vector<8x1xf32> to vector<8x128xf32>
    %128 = arith.subf %118, %127 : vector<8x128xf32>
    %129 = arith.mulf %128, %128 : vector<8x128xf32>
    %cst_52 = arith.constant dense<0.000000e+00> : vector<8xf32>
    %130 = vector.multi_reduction <add>, %129, %cst_52 [1] : vector<8x128xf32> to vector<8xf32>
    %131 = vector.shape_cast %130 : vector<8xf32> to vector<8x1xf32>
    %cst_53 = arith.constant 1.280000e+02 : f32
    %132 = vector.broadcast %cst_53 : f32 to vector<8x1xf32>
    %133 = arith.divf %131, %132 : vector<8x1xf32>
    %134 = vector.broadcast %126 : vector<8x1xf32> to vector<8x128xf32>
    %135 = arith.subf %118, %134 : vector<8x128xf32>
    %cst_54 = arith.constant 9.99999996E-13 : f32
    %136 = vector.broadcast %cst_54 : f32 to vector<8x1xf32>
    %137 = arith.addf %133, %136 : vector<8x1xf32>
    %138 = math.rsqrt %137 : vector<8x1xf32>
    %139 = vector.broadcast %138 : vector<8x1xf32> to vector<8x128xf32>
    %140 = arith.mulf %135, %139 : vector<8x128xf32>
    %141 = vector.broadcast %120 : vector<1x128xf32> to vector<8x128xf32>
    %142 = arith.mulf %140, %141 : vector<8x128xf32>
    %143 = vector.broadcast %122 : vector<1x128xf32> to vector<8x128xf32>
    %144 = arith.addf %142, %143 : vector<8x128xf32>
    %145 = arith.truncf %144 : vector<8x128xf32> to vector<8x128xbf16>
    %c0_55 = arith.constant 0 : index
    %c0_56 = arith.constant 0 : index
    %c0_57 = arith.constant 0 : index
    %146 = vector.load %arg11[%c0_55, %c0_56, %c0_57] : memref<2x128x256xbf16, #tpu.memory_space<vmem>>, vector<1x128x256xbf16>
    %147 = vector.shape_cast %146 : vector<1x128x256xbf16> to vector<128x256xbf16>
    %cst_58 = arith.constant dense<0.000000e+00> : vector<8x256xf32>
    %148 = tpu.matmul %145, %147, %cst_58 {dimension_numbers = #tpu.dot_dimension_numbers<[1], [0], [0], [1], [0, 0, 1, 1], [], []>} : vector<8x128xbf16>, vector<128x256xbf16>, vector<8x256xf32> -> vector<8x256xf32>
    %c0_59 = arith.constant 0 : index
    %c0_60 = arith.constant 0 : index
    %c0_61 = arith.constant 0 : index
    %149 = vector.load %arg12[%c0_59, %c0_60, %c0_61] : memref<2x1x256xf32, #tpu.memory_space<vmem>>, vector<1x1x256xf32>
    %150 = vector.shape_cast %149 : vector<1x1x256xf32> to vector<1x256xf32>
    %151 = vector.broadcast %150 : vector<1x256xf32> to vector<8x256xf32>
    %152 = arith.addf %148, %151 : vector<8x256xf32>
    %153 = arith.mulf %152, %152 : vector<8x256xf32>
    %154 = arith.mulf %152, %153 : vector<8x256xf32>
    %cst_62 = arith.constant 4.471500e-02 : f32
    %155 = vector.broadcast %cst_62 : f32 to vector<8x256xf32>
    %156 = arith.mulf %155, %154 : vector<8x256xf32>
    %157 = arith.addf %152, %156 : vector<8x256xf32>
    %cst_63 = arith.constant 0.797884583 : f32
    %158 = vector.broadcast %cst_63 : f32 to vector<8x256xf32>
    %159 = arith.mulf %158, %157 : vector<8x256xf32>
    %160 = math.tanh %159 : vector<8x256xf32>
    %cst_64 = arith.constant 1.000000e+00 : f32
    %161 = vector.broadcast %cst_64 : f32 to vector<8x256xf32>
    %162 = arith.addf %161, %160 : vector<8x256xf32>
    %cst_65 = arith.constant 5.000000e-01 : f32
    %163 = vector.broadcast %cst_65 : f32 to vector<8x256xf32>
    %164 = arith.mulf %163, %162 : vector<8x256xf32>
    %165 = arith.mulf %152, %164 : vector<8x256xf32>
    %166 = arith.truncf %165 : vector<8x256xf32> to vector<8x256xbf16>
    %c0_66 = arith.constant 0 : index
    %c0_67 = arith.constant 0 : index
    %c0_68 = arith.constant 0 : index
    %167 = vector.load %arg13[%c0_66, %c0_67, %c0_68] : memref<2x256x128xbf16, #tpu.memory_space<vmem>>, vector<1x256x128xbf16>
    %168 = vector.shape_cast %167 : vector<1x256x128xbf16> to vector<256x128xbf16>
    %cst_69 = arith.constant dense<0.000000e+00> : vector<8x128xf32>
    %169 = tpu.matmul %166, %168, %cst_69 {dimension_numbers = #tpu.dot_dimension_numbers<[1], [0], [0], [1], [0, 0, 1, 1], [], []>} : vector<8x256xbf16>, vector<256x128xbf16>, vector<8x128xf32> -> vector<8x128xf32>
    %c0_70 = arith.constant 0 : index
    %c0_71 = arith.constant 0 : index
    %c0_72 = arith.constant 0 : index
    %170 = vector.load %arg14[%c0_70, %c0_71, %c0_72] : memref<2x1x128xf32, #tpu.memory_space<vmem>>, vector<1x1x128xf32>
    %171 = vector.shape_cast %170 : vector<1x1x128xf32> to vector<1x128xf32>
    %172 = vector.broadcast %171 : vector<1x128xf32> to vector<8x128xf32>
    %173 = arith.addf %169, %172 : vector<8x128xf32>
    %174 = arith.addf %173, %144 : vector<8x128xf32>
    %c0_73 = arith.constant 0 : index
    %c0_74 = arith.constant 0 : index
    %c0_75 = arith.constant 0 : index
    %175 = vector.load %arg15[%c0_73, %c0_74, %c0_75] : memref<2x1x128xf32, #tpu.memory_space<vmem>>, vector<1x1x128xf32>
    %176 = vector.shape_cast %175 : vector<1x1x128xf32> to vector<1x128xf32>
    %c0_76 = arith.constant 0 : index
    %c0_77 = arith.constant 0 : index
    %c0_78 = arith.constant 0 : index
    %177 = vector.load %arg16[%c0_76, %c0_77, %c0_78] : memref<2x1x128xf32, #tpu.memory_space<vmem>>, vector<1x1x128xf32>
    %178 = vector.shape_cast %177 : vector<1x1x128xf32> to vector<1x128xf32>
    %cst_79 = arith.constant dense<0.000000e+00> : vector<8xf32>
    %179 = vector.multi_reduction <add>, %174, %cst_79 [1] : vector<8x128xf32> to vector<8xf32>
    %180 = vector.shape_cast %179 : vector<8xf32> to vector<8x1xf32>
    %cst_80 = arith.constant 1.280000e+02 : f32
    %181 = vector.broadcast %cst_80 : f32 to vector<8x1xf32>
    %182 = arith.divf %180, %181 : vector<8x1xf32>
    %183 = vector.broadcast %182 : vector<8x1xf32> to vector<8x128xf32>
    %184 = arith.subf %174, %183 : vector<8x128xf32>
    %185 = arith.mulf %184, %184 : vector<8x128xf32>
    %cst_81 = arith.constant dense<0.000000e+00> : vector<8xf32>
    %186 = vector.multi_reduction <add>, %185, %cst_81 [1] : vector<8x128xf32> to vector<8xf32>
    %187 = vector.shape_cast %186 : vector<8xf32> to vector<8x1xf32>
    %cst_82 = arith.constant 1.280000e+02 : f32
    %188 = vector.broadcast %cst_82 : f32 to vector<8x1xf32>
    %189 = arith.divf %187, %188 : vector<8x1xf32>
    %190 = vector.broadcast %182 : vector<8x1xf32> to vector<8x128xf32>
    %191 = arith.subf %174, %190 : vector<8x128xf32>
    %cst_83 = arith.constant 9.99999996E-13 : f32
    %192 = vector.broadcast %cst_83 : f32 to vector<8x1xf32>
    %193 = arith.addf %189, %192 : vector<8x1xf32>
    %194 = math.rsqrt %193 : vector<8x1xf32>
    %195 = vector.broadcast %194 : vector<8x1xf32> to vector<8x128xf32>
    %196 = arith.mulf %191, %195 : vector<8x128xf32>
    %197 = vector.broadcast %176 : vector<1x128xf32> to vector<8x128xf32>
    %198 = arith.mulf %196, %197 : vector<8x128xf32>
    %199 = vector.broadcast %178 : vector<1x128xf32> to vector<8x128xf32>
    %200 = arith.addf %198, %199 : vector<8x128xf32>
    %201 = arith.truncf %200 : vector<8x128xf32> to vector<8x128xbf16>
    %c1 = arith.constant 1 : index
    %c0_84 = arith.constant 0 : index
    %c0_85 = arith.constant 0 : index
    %202 = vector.load %arg5[%c1, %c0_84, %c0_85] : memref<2x128x384xbf16, #tpu.memory_space<vmem>>, vector<1x128x384xbf16>
    %203 = vector.shape_cast %202 : vector<1x128x384xbf16> to vector<128x384xbf16>
    %cst_86 = arith.constant dense<0.000000e+00> : vector<8x384xf32>
    %204 = tpu.matmul %201, %203, %cst_86 {dimension_numbers = #tpu.dot_dimension_numbers<[1], [0], [0], [1], [0, 0, 1, 1], [], []>} : vector<8x128xbf16>, vector<128x384xbf16>, vector<8x384xf32> -> vector<8x384xf32>
    %c1_87 = arith.constant 1 : index
    %c0_88 = arith.constant 0 : index
    %c0_89 = arith.constant 0 : index
    %205 = vector.load %arg6[%c1_87, %c0_88, %c0_89] : memref<2x1x384xf32, #tpu.memory_space<vmem>>, vector<1x1x384xf32>
    %206 = vector.shape_cast %205 : vector<1x1x384xf32> to vector<1x384xf32>
    %207 = vector.broadcast %206 : vector<1x384xf32> to vector<8x384xf32>
    %208 = arith.addf %204, %207 : vector<8x384xf32>
    %209 = vector.extract_strided_slice %208 {offsets = [0, 0], sizes = [8, 128], strides = [1, 1]} : vector<8x384xf32> to vector<8x128xf32>
    %cst_90 = arith.constant 0.176776692 : f32
    %210 = vector.broadcast %cst_90 : f32 to vector<8x128xf32>
    %211 = arith.mulf %209, %210 : vector<8x128xf32>
    %212 = vector.extract_strided_slice %208 {offsets = [0, 128], sizes = [8, 128], strides = [1, 1]} : vector<8x384xf32> to vector<8x128xf32>
    %213 = vector.extract_strided_slice %208 {offsets = [0, 256], sizes = [8, 128], strides = [1, 1]} : vector<8x384xf32> to vector<8x128xf32>
    %214 = vector.extract_strided_slice %211 {offsets = [0, 0], sizes = [8, 32], strides = [1, 1]} : vector<8x128xf32> to vector<8x32xf32>
    %215 = vector.extract_strided_slice %212 {offsets = [0, 0], sizes = [8, 32], strides = [1, 1]} : vector<8x128xf32> to vector<8x32xf32>
    %216 = vector.extract_strided_slice %213 {offsets = [0, 0], sizes = [8, 32], strides = [1, 1]} : vector<8x128xf32> to vector<8x32xf32>
    %cst_91 = arith.constant dense<0.000000e+00> : vector<8x8xf32>
    %217 = tpu.matmul %214, %215, %cst_91 {dimension_numbers = #tpu.dot_dimension_numbers<[1], [1], [0], [0], [0, 0, 1, 0], [], []>} : vector<8x32xf32>, vector<8x32xf32>, vector<8x8xf32> -> vector<8x8xf32>
    %218 = vector.broadcast %27 : vector<1x8xf32> to vector<8x8xf32>
    %219 = arith.addf %217, %218 : vector<8x8xf32>
    %cst_92 = arith.constant dense<0xFF800000> : vector<8xf32>
    %220 = vector.multi_reduction <maximumf>, %219, %cst_92 [1] : vector<8x8xf32> to vector<8xf32>
    %221 = vector.shape_cast %220 : vector<8xf32> to vector<8x1xf32>
    %222 = vector.broadcast %221 : vector<8x1xf32> to vector<8x8xf32>
    %223 = arith.subf %219, %222 : vector<8x8xf32>
    %224 = math.exp %223 : vector<8x8xf32>
    %cst_93 = arith.constant dense<0.000000e+00> : vector<8xf32>
    %225 = vector.multi_reduction <add>, %224, %cst_93 [1] : vector<8x8xf32> to vector<8xf32>
    %226 = vector.shape_cast %225 : vector<8xf32> to vector<8x1xf32>
    %227 = tpu.reciprocal %226 {approx = true} : vector<8x1xf32> -> vector<8x1xf32>
    %228 = vector.broadcast %227 : vector<8x1xf32> to vector<8x8xf32>
    %229 = arith.mulf %224, %228 : vector<8x8xf32>
    %cst_94 = arith.constant dense<0.000000e+00> : vector<8x32xf32>
    %230 = tpu.matmul %229, %216, %cst_94 {dimension_numbers = #tpu.dot_dimension_numbers<[1], [0], [0], [1], [0, 0, 1, 1], [], []>} : vector<8x8xf32>, vector<8x32xf32>, vector<8x32xf32> -> vector<8x32xf32>
    %231 = vector.extract_strided_slice %211 {offsets = [0, 32], sizes = [8, 32], strides = [1, 1]} : vector<8x128xf32> to vector<8x32xf32>
    %232 = vector.extract_strided_slice %212 {offsets = [0, 32], sizes = [8, 32], strides = [1, 1]} : vector<8x128xf32> to vector<8x32xf32>
    %233 = vector.extract_strided_slice %213 {offsets = [0, 32], sizes = [8, 32], strides = [1, 1]} : vector<8x128xf32> to vector<8x32xf32>
    %cst_95 = arith.constant dense<0.000000e+00> : vector<8x8xf32>
    %234 = tpu.matmul %231, %232, %cst_95 {dimension_numbers = #tpu.dot_dimension_numbers<[1], [1], [0], [0], [0, 0, 1, 0], [], []>} : vector<8x32xf32>, vector<8x32xf32>, vector<8x8xf32> -> vector<8x8xf32>
    %235 = vector.broadcast %27 : vector<1x8xf32> to vector<8x8xf32>
    %236 = arith.addf %234, %235 : vector<8x8xf32>
    %cst_96 = arith.constant dense<0xFF800000> : vector<8xf32>
    %237 = vector.multi_reduction <maximumf>, %236, %cst_96 [1] : vector<8x8xf32> to vector<8xf32>
    %238 = vector.shape_cast %237 : vector<8xf32> to vector<8x1xf32>
    %239 = vector.broadcast %238 : vector<8x1xf32> to vector<8x8xf32>
    %240 = arith.subf %236, %239 : vector<8x8xf32>
    %241 = math.exp %240 : vector<8x8xf32>
    %cst_97 = arith.constant dense<0.000000e+00> : vector<8xf32>
    %242 = vector.multi_reduction <add>, %241, %cst_97 [1] : vector<8x8xf32> to vector<8xf32>
    %243 = vector.shape_cast %242 : vector<8xf32> to vector<8x1xf32>
    %244 = tpu.reciprocal %243 {approx = true} : vector<8x1xf32> -> vector<8x1xf32>
    %245 = vector.broadcast %244 : vector<8x1xf32> to vector<8x8xf32>
    %246 = arith.mulf %241, %245 : vector<8x8xf32>
    %cst_98 = arith.constant dense<0.000000e+00> : vector<8x32xf32>
    %247 = tpu.matmul %246, %233, %cst_98 {dimension_numbers = #tpu.dot_dimension_numbers<[1], [0], [0], [1], [0, 0, 1, 1], [], []>} : vector<8x8xf32>, vector<8x32xf32>, vector<8x32xf32> -> vector<8x32xf32>
    %248 = vector.extract_strided_slice %211 {offsets = [0, 64], sizes = [8, 32], strides = [1, 1]} : vector<8x128xf32> to vector<8x32xf32>
    %249 = vector.extract_strided_slice %212 {offsets = [0, 64], sizes = [8, 32], strides = [1, 1]} : vector<8x128xf32> to vector<8x32xf32>
    %250 = vector.extract_strided_slice %213 {offsets = [0, 64], sizes = [8, 32], strides = [1, 1]} : vector<8x128xf32> to vector<8x32xf32>
    %cst_99 = arith.constant dense<0.000000e+00> : vector<8x8xf32>
    %251 = tpu.matmul %248, %249, %cst_99 {dimension_numbers = #tpu.dot_dimension_numbers<[1], [1], [0], [0], [0, 0, 1, 0], [], []>} : vector<8x32xf32>, vector<8x32xf32>, vector<8x8xf32> -> vector<8x8xf32>
    %252 = vector.broadcast %27 : vector<1x8xf32> to vector<8x8xf32>
    %253 = arith.addf %251, %252 : vector<8x8xf32>
    %cst_100 = arith.constant dense<0xFF800000> : vector<8xf32>
    %254 = vector.multi_reduction <maximumf>, %253, %cst_100 [1] : vector<8x8xf32> to vector<8xf32>
    %255 = vector.shape_cast %254 : vector<8xf32> to vector<8x1xf32>
    %256 = vector.broadcast %255 : vector<8x1xf32> to vector<8x8xf32>
    %257 = arith.subf %253, %256 : vector<8x8xf32>
    %258 = math.exp %257 : vector<8x8xf32>
    %cst_101 = arith.constant dense<0.000000e+00> : vector<8xf32>
    %259 = vector.multi_reduction <add>, %258, %cst_101 [1] : vector<8x8xf32> to vector<8xf32>
    %260 = vector.shape_cast %259 : vector<8xf32> to vector<8x1xf32>
    %261 = tpu.reciprocal %260 {approx = true} : vector<8x1xf32> -> vector<8x1xf32>
    %262 = vector.broadcast %261 : vector<8x1xf32> to vector<8x8xf32>
    %263 = arith.mulf %258, %262 : vector<8x8xf32>
    %cst_102 = arith.constant dense<0.000000e+00> : vector<8x32xf32>
    %264 = tpu.matmul %263, %250, %cst_102 {dimension_numbers = #tpu.dot_dimension_numbers<[1], [0], [0], [1], [0, 0, 1, 1], [], []>} : vector<8x8xf32>, vector<8x32xf32>, vector<8x32xf32> -> vector<8x32xf32>
    %265 = vector.extract_strided_slice %211 {offsets = [0, 96], sizes = [8, 32], strides = [1, 1]} : vector<8x128xf32> to vector<8x32xf32>
    %266 = vector.extract_strided_slice %212 {offsets = [0, 96], sizes = [8, 32], strides = [1, 1]} : vector<8x128xf32> to vector<8x32xf32>
    %267 = vector.extract_strided_slice %213 {offsets = [0, 96], sizes = [8, 32], strides = [1, 1]} : vector<8x128xf32> to vector<8x32xf32>
    %cst_103 = arith.constant dense<0.000000e+00> : vector<8x8xf32>
    %268 = tpu.matmul %265, %266, %cst_103 {dimension_numbers = #tpu.dot_dimension_numbers<[1], [1], [0], [0], [0, 0, 1, 0], [], []>} : vector<8x32xf32>, vector<8x32xf32>, vector<8x8xf32> -> vector<8x8xf32>
    %269 = vector.broadcast %27 : vector<1x8xf32> to vector<8x8xf32>
    %270 = arith.addf %268, %269 : vector<8x8xf32>
    %cst_104 = arith.constant dense<0xFF800000> : vector<8xf32>
    %271 = vector.multi_reduction <maximumf>, %270, %cst_104 [1] : vector<8x8xf32> to vector<8xf32>
    %272 = vector.shape_cast %271 : vector<8xf32> to vector<8x1xf32>
    %273 = vector.broadcast %272 : vector<8x1xf32> to vector<8x8xf32>
    %274 = arith.subf %270, %273 : vector<8x8xf32>
    %275 = math.exp %274 : vector<8x8xf32>
    %cst_105 = arith.constant dense<0.000000e+00> : vector<8xf32>
    %276 = vector.multi_reduction <add>, %275, %cst_105 [1] : vector<8x8xf32> to vector<8xf32>
    %277 = vector.shape_cast %276 : vector<8xf32> to vector<8x1xf32>
    %278 = tpu.reciprocal %277 {approx = true} : vector<8x1xf32> -> vector<8x1xf32>
    %279 = vector.broadcast %278 : vector<8x1xf32> to vector<8x8xf32>
    %280 = arith.mulf %275, %279 : vector<8x8xf32>
    %cst_106 = arith.constant dense<0.000000e+00> : vector<8x32xf32>
    %281 = tpu.matmul %280, %267, %cst_106 {dimension_numbers = #tpu.dot_dimension_numbers<[1], [0], [0], [1], [0, 0, 1, 1], [], []>} : vector<8x8xf32>, vector<8x32xf32>, vector<8x32xf32> -> vector<8x32xf32>
    %282 = tpu.concatenate %230, %247, %264, %281 in 1 : vector<8x32xf32>, vector<8x32xf32>, vector<8x32xf32>, vector<8x32xf32> -> vector<8x128xf32>
    %283 = arith.truncf %282 : vector<8x128xf32> to vector<8x128xbf16>
    %c1_107 = arith.constant 1 : index
    %c0_108 = arith.constant 0 : index
    %c0_109 = arith.constant 0 : index
    %284 = vector.load %arg7[%c1_107, %c0_108, %c0_109] : memref<2x128x128xbf16, #tpu.memory_space<vmem>>, vector<1x128x128xbf16>
    %285 = vector.shape_cast %284 : vector<1x128x128xbf16> to vector<128x128xbf16>
    %cst_110 = arith.constant dense<0.000000e+00> : vector<8x128xf32>
    %286 = tpu.matmul %283, %285, %cst_110 {dimension_numbers = #tpu.dot_dimension_numbers<[1], [0], [0], [1], [0, 0, 1, 1], [], []>} : vector<8x128xbf16>, vector<128x128xbf16>, vector<8x128xf32> -> vector<8x128xf32>
    %c1_111 = arith.constant 1 : index
    %c0_112 = arith.constant 0 : index
    %c0_113 = arith.constant 0 : index
    %287 = vector.load %arg8[%c1_111, %c0_112, %c0_113] : memref<2x1x128xf32, #tpu.memory_space<vmem>>, vector<1x1x128xf32>
    %288 = vector.shape_cast %287 : vector<1x1x128xf32> to vector<1x128xf32>
    %289 = vector.broadcast %288 : vector<1x128xf32> to vector<8x128xf32>
    %290 = arith.addf %286, %289 : vector<8x128xf32>
    %291 = arith.addf %290, %200 : vector<8x128xf32>
    %c1_114 = arith.constant 1 : index
    %c0_115 = arith.constant 0 : index
    %c0_116 = arith.constant 0 : index
    %292 = vector.load %arg9[%c1_114, %c0_115, %c0_116] : memref<2x1x128xf32, #tpu.memory_space<vmem>>, vector<1x1x128xf32>
    %293 = vector.shape_cast %292 : vector<1x1x128xf32> to vector<1x128xf32>
    %c1_117 = arith.constant 1 : index
    %c0_118 = arith.constant 0 : index
    %c0_119 = arith.constant 0 : index
    %294 = vector.load %arg10[%c1_117, %c0_118, %c0_119] : memref<2x1x128xf32, #tpu.memory_space<vmem>>, vector<1x1x128xf32>
    %295 = vector.shape_cast %294 : vector<1x1x128xf32> to vector<1x128xf32>
    %cst_120 = arith.constant dense<0.000000e+00> : vector<8xf32>
    %296 = vector.multi_reduction <add>, %291, %cst_120 [1] : vector<8x128xf32> to vector<8xf32>
    %297 = vector.shape_cast %296 : vector<8xf32> to vector<8x1xf32>
    %cst_121 = arith.constant 1.280000e+02 : f32
    %298 = vector.broadcast %cst_121 : f32 to vector<8x1xf32>
    %299 = arith.divf %297, %298 : vector<8x1xf32>
    %300 = vector.broadcast %299 : vector<8x1xf32> to vector<8x128xf32>
    %301 = arith.subf %291, %300 : vector<8x128xf32>
    %302 = arith.mulf %301, %301 : vector<8x128xf32>
    %cst_122 = arith.constant dense<0.000000e+00> : vector<8xf32>
    %303 = vector.multi_reduction <add>, %302, %cst_122 [1] : vector<8x128xf32> to vector<8xf32>
    %304 = vector.shape_cast %303 : vector<8xf32> to vector<8x1xf32>
    %cst_123 = arith.constant 1.280000e+02 : f32
    %305 = vector.broadcast %cst_123 : f32 to vector<8x1xf32>
    %306 = arith.divf %304, %305 : vector<8x1xf32>
    %307 = vector.broadcast %299 : vector<8x1xf32> to vector<8x128xf32>
    %308 = arith.subf %291, %307 : vector<8x128xf32>
    %cst_124 = arith.constant 9.99999996E-13 : f32
    %309 = vector.broadcast %cst_124 : f32 to vector<8x1xf32>
    %310 = arith.addf %306, %309 : vector<8x1xf32>
    %311 = math.rsqrt %310 : vector<8x1xf32>
    %312 = vector.broadcast %311 : vector<8x1xf32> to vector<8x128xf32>
    %313 = arith.mulf %308, %312 : vector<8x128xf32>
    %314 = vector.broadcast %293 : vector<1x128xf32> to vector<8x128xf32>
    %315 = arith.mulf %313, %314 : vector<8x128xf32>
    %316 = vector.broadcast %295 : vector<1x128xf32> to vector<8x128xf32>
    %317 = arith.addf %315, %316 : vector<8x128xf32>
    %318 = arith.truncf %317 : vector<8x128xf32> to vector<8x128xbf16>
    %c1_125 = arith.constant 1 : index
    %c0_126 = arith.constant 0 : index
    %c0_127 = arith.constant 0 : index
    %319 = vector.load %arg11[%c1_125, %c0_126, %c0_127] : memref<2x128x256xbf16, #tpu.memory_space<vmem>>, vector<1x128x256xbf16>
    %320 = vector.shape_cast %319 : vector<1x128x256xbf16> to vector<128x256xbf16>
    %cst_128 = arith.constant dense<0.000000e+00> : vector<8x256xf32>
    %321 = tpu.matmul %318, %320, %cst_128 {dimension_numbers = #tpu.dot_dimension_numbers<[1], [0], [0], [1], [0, 0, 1, 1], [], []>} : vector<8x128xbf16>, vector<128x256xbf16>, vector<8x256xf32> -> vector<8x256xf32>
    %c1_129 = arith.constant 1 : index
    %c0_130 = arith.constant 0 : index
    %c0_131 = arith.constant 0 : index
    %322 = vector.load %arg12[%c1_129, %c0_130, %c0_131] : memref<2x1x256xf32, #tpu.memory_space<vmem>>, vector<1x1x256xf32>
    %323 = vector.shape_cast %322 : vector<1x1x256xf32> to vector<1x256xf32>
    %324 = vector.broadcast %323 : vector<1x256xf32> to vector<8x256xf32>
    %325 = arith.addf %321, %324 : vector<8x256xf32>
    %326 = arith.mulf %325, %325 : vector<8x256xf32>
    %327 = arith.mulf %325, %326 : vector<8x256xf32>
    %cst_132 = arith.constant 4.471500e-02 : f32
    %328 = vector.broadcast %cst_132 : f32 to vector<8x256xf32>
    %329 = arith.mulf %328, %327 : vector<8x256xf32>
    %330 = arith.addf %325, %329 : vector<8x256xf32>
    %cst_133 = arith.constant 0.797884583 : f32
    %331 = vector.broadcast %cst_133 : f32 to vector<8x256xf32>
    %332 = arith.mulf %331, %330 : vector<8x256xf32>
    %333 = math.tanh %332 : vector<8x256xf32>
    %cst_134 = arith.constant 1.000000e+00 : f32
    %334 = vector.broadcast %cst_134 : f32 to vector<8x256xf32>
    %335 = arith.addf %334, %333 : vector<8x256xf32>
    %cst_135 = arith.constant 5.000000e-01 : f32
    %336 = vector.broadcast %cst_135 : f32 to vector<8x256xf32>
    %337 = arith.mulf %336, %335 : vector<8x256xf32>
    %338 = arith.mulf %325, %337 : vector<8x256xf32>
    %339 = arith.truncf %338 : vector<8x256xf32> to vector<8x256xbf16>
    %c1_136 = arith.constant 1 : index
    %c0_137 = arith.constant 0 : index
    %c0_138 = arith.constant 0 : index
    %340 = vector.load %arg13[%c1_136, %c0_137, %c0_138] : memref<2x256x128xbf16, #tpu.memory_space<vmem>>, vector<1x256x128xbf16>
    %341 = vector.shape_cast %340 : vector<1x256x128xbf16> to vector<256x128xbf16>
    %cst_139 = arith.constant dense<0.000000e+00> : vector<8x128xf32>
    %342 = tpu.matmul %339, %341, %cst_139 {dimension_numbers = #tpu.dot_dimension_numbers<[1], [0], [0], [1], [0, 0, 1, 1], [], []>} : vector<8x256xbf16>, vector<256x128xbf16>, vector<8x128xf32> -> vector<8x128xf32>
    %c1_140 = arith.constant 1 : index
    %c0_141 = arith.constant 0 : index
    %c0_142 = arith.constant 0 : index
    %343 = vector.load %arg14[%c1_140, %c0_141, %c0_142] : memref<2x1x128xf32, #tpu.memory_space<vmem>>, vector<1x1x128xf32>
    %344 = vector.shape_cast %343 : vector<1x1x128xf32> to vector<1x128xf32>
    %345 = vector.broadcast %344 : vector<1x128xf32> to vector<8x128xf32>
    %346 = arith.addf %342, %345 : vector<8x128xf32>
    %347 = arith.addf %346, %317 : vector<8x128xf32>
    %c1_143 = arith.constant 1 : index
    %c0_144 = arith.constant 0 : index
    %c0_145 = arith.constant 0 : index
    %348 = vector.load %arg15[%c1_143, %c0_144, %c0_145] : memref<2x1x128xf32, #tpu.memory_space<vmem>>, vector<1x1x128xf32>
    %349 = vector.shape_cast %348 : vector<1x1x128xf32> to vector<1x128xf32>
    %c1_146 = arith.constant 1 : index
    %c0_147 = arith.constant 0 : index
    %c0_148 = arith.constant 0 : index
    %350 = vector.load %arg16[%c1_146, %c0_147, %c0_148] : memref<2x1x128xf32, #tpu.memory_space<vmem>>, vector<1x1x128xf32>
    %351 = vector.shape_cast %350 : vector<1x1x128xf32> to vector<1x128xf32>
    %cst_149 = arith.constant dense<0.000000e+00> : vector<8xf32>
    %352 = vector.multi_reduction <add>, %347, %cst_149 [1] : vector<8x128xf32> to vector<8xf32>
    %353 = vector.shape_cast %352 : vector<8xf32> to vector<8x1xf32>
    %cst_150 = arith.constant 1.280000e+02 : f32
    %354 = vector.broadcast %cst_150 : f32 to vector<8x1xf32>
    %355 = arith.divf %353, %354 : vector<8x1xf32>
    %356 = vector.broadcast %355 : vector<8x1xf32> to vector<8x128xf32>
    %357 = arith.subf %347, %356 : vector<8x128xf32>
    %358 = arith.mulf %357, %357 : vector<8x128xf32>
    %cst_151 = arith.constant dense<0.000000e+00> : vector<8xf32>
    %359 = vector.multi_reduction <add>, %358, %cst_151 [1] : vector<8x128xf32> to vector<8xf32>
    %360 = vector.shape_cast %359 : vector<8xf32> to vector<8x1xf32>
    %cst_152 = arith.constant 1.280000e+02 : f32
    %361 = vector.broadcast %cst_152 : f32 to vector<8x1xf32>
    %362 = arith.divf %360, %361 : vector<8x1xf32>
    %363 = vector.broadcast %355 : vector<8x1xf32> to vector<8x128xf32>
    %364 = arith.subf %347, %363 : vector<8x128xf32>
    %cst_153 = arith.constant 9.99999996E-13 : f32
    %365 = vector.broadcast %cst_153 : f32 to vector<8x1xf32>
    %366 = arith.addf %362, %365 : vector<8x1xf32>
    %367 = math.rsqrt %366 : vector<8x1xf32>
    %368 = vector.broadcast %367 : vector<8x1xf32> to vector<8x128xf32>
    %369 = arith.mulf %364, %368 : vector<8x128xf32>
    %370 = vector.broadcast %349 : vector<1x128xf32> to vector<8x128xf32>
    %371 = arith.mulf %369, %370 : vector<8x128xf32>
    %372 = vector.broadcast %351 : vector<1x128xf32> to vector<8x128xf32>
    %373 = arith.addf %371, %372 : vector<8x128xf32>
    %374 = vector.extract_strided_slice %373 {offsets = [0, 0], sizes = [1, 128], strides = [1, 1]} : vector<8x128xf32> to vector<1x128xf32>
    %375 = arith.truncf %374 : vector<1x128xf32> to vector<1x128xbf16>
    %c0_154 = arith.constant 0 : index
    %c0_155 = arith.constant 0 : index
    %376 = vector.load %arg17[%c0_154, %c0_155] : memref<128x128xbf16, #tpu.memory_space<vmem>>, vector<128x128xbf16>
    %cst_156 = arith.constant dense<0.000000e+00> : vector<1x128xf32>
    %377 = tpu.matmul %375, %376, %cst_156 {dimension_numbers = #tpu.dot_dimension_numbers<[1], [0], [0], [1], [0, 0, 1, 1], [], []>} : vector<1x128xbf16>, vector<128x128xbf16>, vector<1x128xf32> -> vector<1x128xf32>
    %c0_157 = arith.constant 0 : index
    %c0_158 = arith.constant 0 : index
    %378 = vector.load %arg18[%c0_157, %c0_158] : memref<1x128xf32, #tpu.memory_space<vmem>>, vector<1x128xf32>
    %379 = arith.addf %377, %378 : vector<1x128xf32>
    %380 = math.tanh %379 : vector<1x128xf32>
    %381 = arith.truncf %380 : vector<1x128xf32> to vector<1x128xbf16>
    %c0_159 = arith.constant 0 : index
    %c0_160 = arith.constant 0 : index
    %382 = vector.load %arg19[%c0_159, %c0_160] : memref<128x128xbf16, #tpu.memory_space<vmem>>, vector<128x128xbf16>
    %cst_161 = arith.constant dense<0.000000e+00> : vector<1x128xf32>
    %383 = tpu.matmul %381, %382, %cst_161 {dimension_numbers = #tpu.dot_dimension_numbers<[1], [0], [0], [1], [0, 0, 1, 1], [], []>} : vector<1x128xbf16>, vector<128x128xbf16>, vector<1x128xf32> -> vector<1x128xf32>
    %c0_162 = arith.constant 0 : index
    %c0_163 = arith.constant 0 : index
    %384 = vector.load %arg20[%c0_162, %c0_163] : memref<1x128xf32, #tpu.memory_space<vmem>>, vector<1x128xf32>
    %385 = arith.addf %383, %384 : vector<1x128xf32>
    %c0_164 = arith.constant 0 : index
    %c0_165 = arith.constant 0 : index
    %c0_166 = arith.constant 0 : index
    %386 = vector.load %arg21[%c0_164, %c0_165, %c0_166] : memref<1x1x128xf32, #tpu.memory_space<vmem>>, vector<1x1x128xf32>
    %387 = vector.shape_cast %386 : vector<1x1x128xf32> to vector<1x128xf32>
    %388 = vector.shape_cast %385 : vector<1x128xf32> to vector<1x1x128xf32>
    tpu.vector_store %arg21[%c0_164, %c0_165, %c0_166], %388 {strides = array<i32>} : memref<1x1x128xf32, #tpu.memory_space<vmem>>, vector<1x1x128xf32>,
    return
  }
  func.func @transform_0(%arg0: i32) -> (i32, i32, i32) {
    %c0_i32 = arith.constant 0 : i32
    %c0_i32_0 = arith.constant 0 : i32
    %c0_i32_1 = arith.constant 0 : i32
    return %arg0, %c0_i32, %c0_i32_0 : i32, i32, i32
  }
  func.func @transform_1(%arg0: i32) -> (i32, i32, i32) {
    %c0_i32 = arith.constant 0 : i32
    %c0_i32_0 = arith.constant 0 : i32
    %c0_i32_1 = arith.constant 0 : i32
    return %arg0, %c0_i32, %c0_i32_0 : i32, i32, i32
  }
  func.func @transform_2(%arg0: i32) -> (i32, i32) {
    %c0_i32 = arith.constant 0 : i32
    %c0_i32_0 = arith.constant 0 : i32
    %c0_i32_1 = arith.constant 0 : i32
    return %c0_i32, %c0_i32_0 : i32, i32
  }
  func.func @transform_3(%arg0: i32) -> (i32, i32) {
    %c0_i32 = arith.constant 0 : i32
    %c0_i32_0 = arith.constant 0 : i32
    %c0_i32_1 = arith.constant 0 : i32
    return %c0_i32, %c0_i32_0 : i32, i32
  }
  func.func @transform_4(%arg0: i32) -> (i32, i32, i32) {
    %c0_i32 = arith.constant 0 : i32
    %c0_i32_0 = arith.constant 0 : i32
    %c0_i32_1 = arith.constant 0 : i32
    %c0_i32_2 = arith.constant 0 : i32
    return %c0_i32, %c0_i32_0, %c0_i32_1 : i32, i32, i32
  }
  func.func @transform_5(%arg0: i32) -> (i32, i32, i32) {
    %c0_i32 = arith.constant 0 : i32
    %c0_i32_0 = arith.constant 0 : i32
    %c0_i32_1 = arith.constant 0 : i32
    %c0_i32_2 = arith.constant 0 : i32
    return %c0_i32, %c0_i32_0, %c0_i32_1 : i32, i32, i32
  }
  func.func @transform_6(%arg0: i32) -> (i32, i32, i32) {
    %c0_i32 = arith.constant 0 : i32
    %c0_i32_0 = arith.constant 0 : i32
    %c0_i32_1 = arith.constant 0 : i32
    %c0_i32_2 = arith.constant 0 : i32
    return %c0_i32, %c0_i32_0, %c0_i32_1 : i32, i32, i32
  }
  func.func @transform_7(%arg0: i32) -> (i32, i32, i32) {
    %c0_i32 = arith.constant 0 : i32
    %c0_i32_0 = arith.constant 0 : i32
    %c0_i32_1 = arith.constant 0 : i32
    %c0_i32_2 = arith.constant 0 : i32
    return %c0_i32, %c0_i32_0, %c0_i32_1 : i32, i32, i32
  }
  func.func @transform_8(%arg0: i32) -> (i32, i32, i32) {
    %c0_i32 = arith.constant 0 : i32
    %c0_i32_0 = arith.constant 0 : i32
    %c0_i32_1 = arith.constant 0 : i32
    %c0_i32_2 = arith.constant 0 : i32
    return %c0_i32, %c0_i32_0, %c0_i32_1 : i32, i32, i32
  }
  func.func @transform_9(%arg0: i32) -> (i32, i32, i32) {
    %c0_i32 = arith.constant 0 : i32
    %c0_i32_0 = arith.constant 0 : i32
    %c0_i32_1 = arith.constant 0 : i32
    %c0_i32_2 = arith.constant 0 : i32
    return %c0_i32, %c0_i32_0, %c0_i32_1 : i32, i32, i32
  }
  func.func @transform_10(%arg0: i32) -> (i32, i32, i32) {
    %c0_i32 = arith.constant 0 : i32
    %c0_i32_0 = arith.constant 0 : i32
    %c0_i32_1 = arith.constant 0 : i32
    %c0_i32_2 = arith.constant 0 : i32
    return %c0_i32, %c0_i32_0, %c0_i32_1 : i32, i32, i32
  }
  func.func @transform_11(%arg0: i32) -> (i32, i32, i32) {
    %c0_i32 = arith.constant 0 : i32
    %c0_i32_0 = arith.constant 0 : i32
    %c0_i32_1 = arith.constant 0 : i32
    %c0_i32_2 = arith.constant 0 : i32
    return %c0_i32, %c0_i32_0, %c0_i32_1 : i32, i32, i32
  }
  func.func @transform_12(%arg0: i32) -> (i32, i32, i32) {
    %c0_i32 = arith.constant 0 : i32
    %c0_i32_0 = arith.constant 0 : i32
    %c0_i32_1 = arith.constant 0 : i32
    %c0_i32_2 = arith.constant 0 : i32
    return %c0_i32, %c0_i32_0, %c0_i32_1 : i32, i32, i32
  }
  func.func @transform_13(%arg0: i32) -> (i32, i32, i32) {
    %c0_i32 = arith.constant 0 : i32
    %c0_i32_0 = arith.constant 0 : i32
    %c0_i32_1 = arith.constant 0 : i32
    %c0_i32_2 = arith.constant 0 : i32
    return %c0_i32, %c0_i32_0, %c0_i32_1 : i32, i32, i32
  }
  func.func @transform_14(%arg0: i32) -> (i32, i32, i32) {
    %c0_i32 = arith.constant 0 : i32
    %c0_i32_0 = arith.constant 0 : i32
    %c0_i32_1 = arith.constant 0 : i32
    %c0_i32_2 = arith.constant 0 : i32
    return %c0_i32, %c0_i32_0, %c0_i32_1 : i32, i32, i32
  }
  func.func @transform_15(%arg0: i32) -> (i32, i32, i32) {
    %c0_i32 = arith.constant 0 : i32
    %c0_i32_0 = arith.constant 0 : i32
    %c0_i32_1 = arith.constant 0 : i32
    %c0_i32_2 = arith.constant 0 : i32
    return %c0_i32, %c0_i32_0, %c0_i32_1 : i32, i32, i32
  }
  func.func @transform_16(%arg0: i32) -> (i32, i32) {
    %c0_i32 = arith.constant 0 : i32
    %c0_i32_0 = arith.constant 0 : i32
    %c0_i32_1 = arith.constant 0 : i32
    return %c0_i32, %c0_i32_0 : i32, i32
  }
  func.func @transform_17(%arg0: i32) -> (i32, i32) {
    %c0_i32 = arith.constant 0 : i32
    %c0_i32_0 = arith.constant 0 : i32
    %c0_i32_1 = arith.constant 0 : i32
    return %c0_i32, %c0_i32_0 : i32, i32
  }
  func.func @transform_18(%arg0: i32) -> (i32, i32) {
    %c0_i32 = arith.constant 0 : i32
    %c0_i32_0 = arith.constant 0 : i32
    %c0_i32_1 = arith.constant 0 : i32
    return %c0_i32, %c0_i32_0 : i32, i32
  }
  func.func @transform_19(%arg0: i32) -> (i32, i32) {
    %c0_i32 = arith.constant 0 : i32
    %c0_i32_0 = arith.constant 0 : i32
    %c0_i32_1 = arith.constant 0 : i32
    return %c0_i32, %c0_i32_0 : i32, i32
  }
  func.func @transform_20(%arg0: i32) -> (i32, i32, i32) {
    %c0_i32 = arith.constant 0 : i32
    %c0_i32_0 = arith.constant 0 : i32
    %c0_i32_1 = arith.constant 0 : i32
    return %arg0, %c0_i32, %c0_i32_0 : i32, i32, i32
  }
}

</mosaic_0001>

<bundles_post_ra>
// kernel: rate_classifier_forward.1
= control target key start
LH: loop header
LB: loop body
LE: loop exit
PB: predicated region body
PF: predicated region fallthrough
CT: control target
= control target key end

     0   :  { %s5767_s0 = inlined_call_operand.vmem [shape: f32[2,8,128], index: 0, kind: input, shape index: {}]   ;;  %s5768_s1 = inlined_call_operand.vmem [shape: f32[2,1,8], index: 1, kind: input, shape index: {}]   ;;  %s5769_s2 = inlined_call_operand.vmem [shape: f32[1,128], index: 2, kind: input, shape index: {}]   ;;  %s5770_s3 = inlined_call_operand.vmem [shape: f32[1,128], index: 3, kind: input, shape index: {}]   ;;  %s5771_s4 = inlined_call_operand.hbm [shape: bf16[2,128,384], index: 4, kind: input, shape index: {}]   ;;  %s5772_s5 = inlined_call_operand.vmem [shape: f32[2,1,384], index: 5, kind: input, shape index: {}]   ;;  %s5773_s6 = inlined_call_operand.vmem [shape: bf16[2,128,128], index: 6, kind: input, shape index: {}]   ;;  %s5774_s7 = inlined_call_operand.vmem [shape: f32[2,1,128], index: 7, kind: input, shape index: {}]   ;;  %s5775_s8 = inlined_call_operand.vmem [shape: f32[2,1,128], index: 8, kind: input, shape index: {}]   ;;  %s5776_s9 = inlined_call_operand.vmem [shape: f32[2,1,128], index: 9, kind: input, shape index: {}]   ;;  %s5777_s10 = inlined_call_operand.hbm [shape: bf16[2,128,256], index: 10, kind: input, shape index: {}]   ;;  %s5778_s11 = inlined_call_operand.vmem [shape: f32[2,1,256], index: 11, kind: input, shape index: {}]   ;;  %s5779_s12 = inlined_call_operand.hbm [shape: bf16[2,256,128], index: 12, kind: input, shape index: {}]   ;;  %s5780_s13 = inlined_call_operand.vmem [shape: f32[2,1,128], index: 13, kind: input, shape index: {}]   ;;  %s5781_s14 = inlined_call_operand.vmem [shape: f32[2,1,128], index: 14, kind: input, shape index: {}]   ;;  %s5782_s15 = inlined_call_operand.vmem [shape: f32[2,1,128], index: 15, kind: input, shape index: {}]   ;;  %s5783_s16 = inlined_call_operand.vmem [shape: bf16[128,128], index: 16, kind: input, shape index: {}]   ;;  %s5784_s17 = inlined_call_operand.vmem [shape: f32[1,128], index: 17, kind: input, shape index: {}]   ;;  %s5785_s18 = inlined_call_operand.hbm [shape: bf16[128,128], index: 18, kind: input, shape index: {}]   ;;  %s5786_s19 = inlined_call_operand.vmem [shape: f32[1,128], index: 19, kind: input, shape index: {}]   ;;  %s5787_s20 = inlined_call_operand.hbm [shape: f32[2,1,128], index: 20, kind: output, shape index: {}]  }
   0x1   :  { %5802 = sst [smem:[#allocation23_spill]] %s5767_s0 }
   0x2   :  { %5803 = sst [smem:[#allocation24_spill]] %s5768_s1 }
   0x3   :  { %5804 = sst [smem:[#allocation25_spill]] %s5769_s2 }
   0x4   :  { %5805 = sst [smem:[#allocation26_spill]] %s5770_s3 }
   0x5   :  { %5806 = sst [smem:[#allocation27_spill]] %s5771_s4 }
   0x6   :  { %5807 = sst [smem:[#allocation28_spill]] %s5777_s10 }
   0x7   :  { %5808 = sst [smem:[#allocation29_spill]] %s5784_s17 }
   0x8   :  { %5809 = sst [smem:[#allocation30_spill]] %s5786_s19 }
   0x9   :  { %5810 = sst [smem:[#allocation31_spill]] %s5787_s20 }
   0xa   :  { %25 = vsyncpa [#allocation3], 0 }
   0xb   :  { %26 = vsyncpa [#allocation6], 0 }
   0xc   :  { %27 = vsyncpa [#allocation9], 0 }
   0xd   :  { %28 = vsyncpa [#allocation4], 0 }
   0xe   :  { %30 = vsyncpa [#allocation4 + $0x1], 0  ;;  %s5153_s1 = smov 0   ;;  %s5155_s22 = smov 0  }
   0xf   :  { %s5157_s23 = smov 0   ;;  %s5159_s24 = smov 0  }
  0x10 LB: > { %5811 = sst [smem:[#allocation15_spill]] %s5017_s1  ;;  %s5174_s2 = sadd.s32 4294967295, %s5029_s24   ;;  %s5029_s24 = sphi %s5159_s24, %s5848_s24   ;;  %s5025_s23 = sphi %s5157_s23, %s5851_s23   ;;  %s5021_s22 = sphi %s5155_s22, %s5850_s22   ;;  %s5017_s1 = sphi %s5153_s1, %s5849_s1  }
  0x11   : > { %5812 = sst [smem:[#allocation16_spill]] %s5021_s22  ;;  %s3970_s25 = sadd.s32 4294967294, %s5029_s24  }
  0x12   : > { %5813 = sst [smem:[#allocation17_spill]] %s5025_s23  ;;  %s5178_s3 = sadd.s32 1, %s5029_s24  }
  0x13   : > { %5814 = sst [smem:[#allocation18_spill]] %s5029_s24  ;;  %s473_s26 = sadd.s32 1, %s5025_s23 }
  0x14   : > { %5815 = sst [smem:[#allocation19_spill]] %s5178_s3  ;;  %s470_s27 = ssub.s32 %s5029_s24, %s5178_s3 }
  0x15   : > { %p483_p0 = scmp.ne.s32.totalorder %s5025_s23, %s5021_s22  ;;  %p471_p1 = scmp.eq.s32.totalorder %s470_s27, 0 }
  0x16   : > { %p484_p2 = scmp.eq.s32.totalorder %s5174_s2, 1  ;;  %p489_p3 = scmp.ne.s32.totalorder %s5021_s22, %s5017_s1 }
  0x17   : > { %p490_p4 = scmp.eq.s32.totalorder %s3970_s25, 1  ;;  %p3971_p7 = scmp.ge.s32.totalorder %s5029_s24, 1 }
  0x18   : > { %s5189_s28 = scalar_select %p471_p1, %s5025_s23, %s473_s26  }
  0x19   : > { %p5191_p5 = por %p484_p2, %p483_p0  ;;  %p5195_p6 = por %p490_p4, %p489_p3 }
  0x1a   : > { %5816 = sst [smem:[#allocation20_spill]] %s5189_s28  ;;  %p497_p8 = scmp.lt.s32.totalorder %s5029_s24, 3 }
  0x1b   : > { %s5817_s4 = scalar_select %p5191_p5, 1, 0 }
  0x1c   : > { %s5819_s29 = scalar_select %p5195_p6, 1, 0 }
  0x1d   : > { %5818 = sst [smem:[#allocation21_spill]] %s5817_s4  ;;  %p5795_p9 = scmp.eq.s32.totalorder %s5174_s2, 0 }
  0x1e   : > { %5820 = sst [smem:[#allocation22_spill]] %s5819_s29  ;;  %p5202_p10 = pnand %p3971_p7, %p497_p8 }
  0x1f   : > { %s5031_s0 = smov [#allocation5]   ;;  %s5032_s26 = smov [#allocation2]  }
  0x20   : > { %s5821_s30 = scalar_select %p5202_p10, 1, 0 }
  0x21   : > { %s543_s21 = sshll.u32 %s5031_s0, 4  ;;  %p4541_p11 = pneg %p5202_p10  ;;  %s544_s21 = int_to_ptr.vmem [resolvable:$true] %s543_s21 }
  0x22   : > { %s515_s27 = sshll.u32 %s5032_s26, 4  ;;  %s5823_s10 = sld [smem:[#allocation28_spill]]  ;;  %s5214_s27 = int_to_ptr.vmem [resolvable:$true] %s515_s27 }
  0x23   : > { %p5210_p12 = pnand %p5795_p9, %p4541_p11 }
  0x25   : > { %p5224_p0 = pneg %p5210_p12 }
  0x28   : > { %s4843_s3 = scalar_lea.hbm %s5823_s10, 4096 }
  0x29   : > { %p4844_p13 = scmp.ne.s32.totalorder %s5823_s10, %s4843_s3  ;;  %p4850_p3 = scmp.lt.u32.totalorder %s4843_s3, %s5823_s10 }
  0x2b   : > { %p4846_p1 = pnand %p5224_p0, %p4844_p13 }
  0x2d   : > { %p4847_p2 = pneg %p4846_p1 }
  0x2f   : > { %p4852_p4 = pnand %p4850_p3, %p4847_p2 }
  0x31   : > { %4855 = shalt.err (!%p4852_p4)
}
  0x32   : > { %s4856_s23 = scalar_lea.vmem %s544_s21, 4096  ;;  %p4864_p9 = scmp.lt.s32.totalorder %s544_s21, %s544_s21 }
  0x33   : > { %p4857_p7 = scmp.ne.s32.totalorder %s544_s21, %s4856_s23  ;;  %p4865_p6 = scmp.lt.s32.totalorder %s4856_s23, %s4856_s23 }
  0x35   : > { %p4859_p8 = pnand %p4857_p7, %p5224_p0  ;;  %p4866_p5 = por %p4865_p6, %p4864_p9 }
  0x37   : > { %p4860_p11 = pneg %p4859_p8 }
  0x39   : > { %p4867_p10 = pnand %p4866_p5, %p4860_p11 }
  0x3b   : > { %4870 = shalt.err (!%p4867_p10)
}
  0x3c   : > { %s5033_s1 = smov 128   ;;  %s5034_s28 = smov 8  }
  0x3d   : > { %4547 = dma.hbm_to_vmem [thread:$0]  (!%p5210_p12), %s5823_s10, 4096, %s544_s21, [#allocation6], %s5033_s1, %s5033_s1, %s5034_s28  }
  0x3e   : > { %s5825_s20 = sld [smem:[#allocation27_spill]] }
  0x44   : > { %s4871_s4 = scalar_lea.hbm %s5825_s20, 6144 }
  0x45   : > { %p4872_p13 = scmp.ne.s32.totalorder %s5825_s20, %s4871_s4  ;;  %p4878_p9 = scmp.lt.u32.totalorder %s4871_s4, %s5825_s20 }
  0x47   : > { %p4874_p5 = pnand %p4872_p13, %p5224_p0 }
  0x49   : > { %p4875_p6 = pneg %p4874_p5 }
  0x4b   : > { %p4880_p10 = pnand %p4878_p9, %p4875_p6 }
  0x4d   : > { %4883 = shalt.err (!%p4880_p10)
}
  0x4e   : > { %s4884_s21 = scalar_lea.vmem %s5214_s27, 6144  ;;  %p4892_p4 = scmp.lt.s32.totalorder %s5214_s27, %s5214_s27 }
  0x4f   : > { %p4885_p1 = scmp.ne.s32.totalorder %s5214_s27, %s4884_s21  ;;  %p4893_p7 = scmp.lt.s32.totalorder %s4884_s21, %s4884_s21 }
  0x51   : > { %p4887_p2 = pnand %p4885_p1, %p5224_p0  ;;  %p4894_p8 = por %p4893_p7, %p4892_p4 }
  0x53   : > { %p4888_p3 = pneg %p4887_p2 }
  0x55   : > { %p4895_p11 = pnand %p4894_p8, %p4888_p3 }
  0x57   : > { %4898 = shalt.err (!%p4895_p11)
}
  0x58   : > { %s5035_s17 = smov 192   ;;  %s5036_s19 = smov 12  }
  0x59   : > { %4544 = dma.hbm_to_vmem [thread:$0]  (!%p5210_p12), %s5825_s20, 6144, %s5214_s27, [#allocation3], %s5035_s17, %s5035_s17, %s5036_s19  }
  0x5a   : > { %s5037_s1 = smov [#allocation7]   ;;  %s4899_s29 = scalar_lea.hbm %s5779_s12, 4096 }
  0x5b   : > { %s559_s28 = sshll.u32 %s5037_s1, 4  ;;  %p4900_p13 = scmp.ne.s32.totalorder %s5779_s12, %s4899_s29  ;;  %s560_s28 = int_to_ptr.vmem [resolvable:$true] %s559_s28 }
  0x5c   : > { %p4906_p9 = scmp.lt.u32.totalorder %s4899_s29, %s5779_s12 }
  0x5d   : > { %p4902_p5 = pnand %p4900_p13, %p5224_p0 }
  0x5f   : > { %p4903_p6 = pneg %p4902_p5 }
  0x61   : > { %p4908_p10 = pnand %p4906_p9, %p4903_p6 }
  0x63   : > { %4911 = shalt.err (!%p4908_p10)
}
  0x64   : > { %s4912_s27 = scalar_lea.vmem %s560_s28, 4096  ;;  %p4920_p4 = scmp.lt.s32.totalorder %s560_s28, %s560_s28 }
  0x65   : > { %p4913_p1 = scmp.ne.s32.totalorder %s560_s28, %s4912_s27  ;;  %p4921_p7 = scmp.lt.s32.totalorder %s4912_s27, %s4912_s27 }
  0x67   : > { %p4915_p2 = pnand %p4913_p1, %p5224_p0  ;;  %p4922_p8 = por %p4921_p7, %p4920_p4 }
  0x69   : > { %p4916_p3 = pneg %p4915_p2 }
  0x6b   : > { %p4923_p11 = pnand %p4922_p8, %p4916_p3 }
  0x6d   : > { %4926 = shalt.err (!%p4923_p11)
}
  0x6e   : > { %s5038_s17 = smov 64   ;;  %s5039_s19 = smov 4  }
  0x6f   : > { %4550 = dma.hbm_to_vmem [thread:$0]  (!%p5210_p12), %s5779_s12, 4096, %s560_s28, [#allocation6], %s5038_s17, %s5038_s17, %s5039_s19  }
  0x70   : > { %s5040_s4 = smov [#allocation8]   ;;  %s4927_s29 = scalar_lea.hbm %s5785_s18, 1024 }
  0x71   : > { %s587_s1 = sshll.u32 %s5040_s4, 4  ;;  %p4928_p13 = scmp.ne.s32.totalorder %s5785_s18, %s4927_s29  ;;  %s588_s1 = int_to_ptr.vmem [resolvable:$true] %s587_s1 }
  0x72   : > { %p4934_p9 = scmp.lt.u32.totalorder %s4927_s29, %s5785_s18 }
  0x73   : > { %p4930_p5 = pnand %p4928_p13, %p5224_p0 }
  0x75   : > { %p4931_p6 = pneg %p4930_p5 }
  0x77   : > { %p4936_p10 = pnand %p4934_p9, %p4931_p6 }
  0x79   : > { %4939 = shalt.err (!%p4936_p10)
}
  0x7a   : > { %s4940_s28 = scalar_lea.vmem %s588_s1, 1024  ;;  %p4948_p4 = scmp.lt.s32.totalorder %s588_s1, %s588_s1 }
  0x7b   : > { %p4941_p1 = scmp.ne.s32.totalorder %s588_s1, %s4940_s28  ;;  %p4949_p7 = scmp.lt.s32.totalorder %s4940_s28, %s4940_s28 }
  0x7d   : > { %p4943_p2 = pnand %p4941_p1, %p5224_p0  ;;  %p4950_p8 = por %p4949_p7, %p4948_p4 }
  0x7f   : > { %p4944_p3 = pneg %p4943_p2 }
  0x81   : > { %p4951_p11 = pnand %p4950_p8, %p4944_p3 }
  0x83   : > { %4954 = shalt.err (!%p4951_p11)
}
  0x84   : > { %4553 = dma.hbm_to_vmem [thread:$0]  (!%p5210_p12), %s5785_s18, 1024, %s588_s1, [#allocation9], %s5038_s17, %s5038_s17, %s5039_s19  }
  0x85   : > { %p5826_p13 = scmp.ne.s32.totalorder %s5821_s30, 0 }
  0x86   : > { %p5827_p5 = scmp.eq.s32.totalorder (!%p5826_p13), %s5174_s2, 0 }
  0x87   : > { %619 = sbr.rel (%p5826_p13) target bundleno = 8354 (0x20a2), region = 100 }
  0x8e   : > { %5000 = dma.done.wait (%p5827_p5), [#allocation3], 6144   ;;  %p5828_p0 = pmov %p5827_p5 }
  0x90   : > { %5002 = vsyncadd (%p5828_p0), [#allocation3], 4294961152  ;;  %p5829_p6 = pmov %p5828_p0 }
  0x91   : > { %p5830_p9 = pmov %p5828_p0 }
  0x92   : > { %5004 = dma.done.wait (%p5829_p6), [#allocation6], 8192  }
  0x93   : > { %5006 = vsyncadd (%p5830_p9), [#allocation6], 4294959104  ;;  %p5831_p10 = pmov %p5828_p0 }
  0x94   : > { %p5832_p12 = pmov %p5828_p0 }
  0x95   : > { %5008 = dma.done.wait (%p5831_p10), [#allocation9], 1024  }
  0x96   : > { %5010 = vsyncadd (%p5832_p12), [#allocation9], 4294966272  ;;  %p690_p1 = scmp.lt.s32.totalorder %s5174_s2, 1  ;;  %s5833_s19 = sld [smem:[#allocation23_spill]]  ;;  %v4615_v1 = vld [vmem:[#allocation2 + $0x4] ss:$12 sps:$4 sm:$0xff]   ;;  %v763_v41 = vlaneseq }
  0x97   : > { %v4617_v2 = vld [vmem:[#allocation2] ss:$12 sps:$4 sm:$0xff]   ;;  %v5041_v3 = vmov 0.0   ;;  %v4618_v4 = vld [vmem:[#allocation2 + $0x8] ss:$12 sps:$4 sm:$0xff]   ;;  %906 = vmatprep.subr.bf16.mxu0 %v4615_v1  ;;  %v5042_v25 = vmov 0  }
  0x98   : > { %s5315_s30 = scalar_select %p690_p1, %s5174_s2, 1  ;;  %4323 = vmatprep.subr.bf16.mxu1 %v5041_v3  ;;  %v4619_v5 = vld [vmem:[#allocation2 + $0x1c] ss:$12 sps:$4 sm:$0xff]   ;;  %v4621_v6 = vld [vmem:[#allocation2 + $0x18] ss:$12 sps:$4 sm:$0xff]   ;;  %907 = vmatpush1.bf16.msra.mxu0 %v4617_v2  ;;  %vm5043_vm0 = vmmov 0  }
  0x99   : > { %v4622_v7 = vld [vmem:[#allocation2 + $0x20] ss:$12 sps:$4 sm:$0xff]   ;;  %4324 = vmatpush3.bf16.msra.mxu1 %v4618_v4  ;;  %908 = vmatprep.subr.bf16.mxu0 %v4619_v5  ;;  %v4625_v13 = vld [vmem:[#allocation2 + $0x30] ss:$12 sps:$4 sm:$0xff]   ;;  %v4626_v14 = vld [vmem:[#allocation2 + $0x38] ss:$12 sps:$4 sm:$0xff]  }
  0x9a   : > { %s3982_s25 = sshll.u32 %s5315_s30, 3  ;;  %v4623_v8 = vld [vmem:[#allocation2 + $0x34] ss:$12 sps:$4 sm:$0xff]   ;;  %4325 = vmatprep.subr.bf16.mxu1 %v5041_v3  ;;  %v4627_v15 = vld [vmem:[#allocation2 + $0x4c] ss:$12 sps:$4 sm:$0xff]   ;;  %938 = vmatprep.mubr.bf16.mxu0 %v5042_v25  ;;  %s5834_s3 = sld [smem:[#allocation25_spill]] }
  0x9b   : > { %v4629_v16 = vld [vmem:[#allocation2 + $0x48] ss:$12 sps:$4 sm:$0xff]   ;;  %v4630_v17 = vld [vmem:[#allocation2 + $0x50] ss:$12 sps:$4 sm:$0xff]   ;;  %v4633_v19 = vld [vmem:[#allocation2 + $0x60] ss:$12 sps:$4 sm:$0xff]   ;;  %4339 = vmatprep.mubr.msk.bf16.mxu1 %vm5043_vm0, %v5041_v3 }
  0x9c   : > { %s693_s4 = scalar_lea.vmem %s5833_s19, %s3982_s25  ;;  %909 = vmatpush1.bf16.msra.mxu0 %v4621_v6  ;;  %v4631_v18 = vld [vmem:[#allocation2 + $0x64] ss:$12 sps:$4 sm:$0xff]   ;;  %v4634_v20 = vld [vmem:[#allocation2 + $0x68] ss:$12 sps:$4 sm:$0xff]   ;;  %v4638_v23 = vld [vmem:[#allocation2 + $0x80] ss:$12 sps:$4 sm:$0xff]  }
  0x9d   : > { %v698_v0 = vld [vmem:[%s693_s4] sm:$0xff]  ;;  %4326 = vmatpush3.bf16.msra.mxu1 %v4622_v7  ;;  %910 = vmatprep.subr.bf16.mxu0 %v4623_v8  ;;  %v4635_v21 = vld [vmem:[#allocation2 + $0x7c] ss:$12 sps:$4 sm:$0xff]   ;;  %v4643_v28 = vld [vmem:[#allocation2 + $0xac] ss:$12 sps:$4 sm:$0xff]   ;;  %s5835_s23 = sld [smem:[#allocation26_spill]] }
  0x9e   : > { %701 = vadd.xlane.f32.xlu0 %v698_v0  ;;  %4327 = vmatprep.subr.bf16.mxu1 %v5041_v3  ;;  %v4637_v22 = vld [vmem:[#allocation2 + $0x78] ss:$12 sps:$4 sm:$0xff]   ;;  %v4639_v24 = vld [vmem:[#allocation2 + $0x94] ss:$12 sps:$4 sm:$0xff]   ;;  %v4641_v26 = vld [vmem:[#allocation2 + $0x90] ss:$12 sps:$4 sm:$0xff]  }
  0x9f   : > { %v4642_v27 = vld [vmem:[#allocation2 + $0x98] ss:$12 sps:$4 sm:$0xff]   ;;  %v4645_v29 = vld [vmem:[#allocation2 + $0xa8] ss:$12 sps:$4 sm:$0xff]   ;;  %v4646_v30 = vld [vmem:[#allocation2 + $0xb0] ss:$12 sps:$4 sm:$0xff]  }
  0xa0   : > { %911 = vmatpush1.bf16.msra.mxu0 %v4625_v13  ;;  %v3983_v35 = vld [vmem:[%s5834_s3] ss:$0 sm:$0xff]  ;;  %v5348_v42 = vshrl.u32 %v763_v41, 7  ;;  %vm994_vm1 = vcmask 261120   ;;  %s5044_s28 = smov 96   ;;  %s5836_s25 = sld [smem:[#allocation24_spill]] }
  0xa1   : > { %4328 = vmatpush3.bf16.msra.mxu1 %v4626_v14  ;;  %912 = vmatprep.subr.bf16.mxu0 %v4627_v15  ;;  %v761_v44 = vld [vmem:[%s5772_s5] sm:$0x7]  ;;  %vm1071_vm2 = vcmask 64512   ;;  %s5046_s17 = smov 32   ;;  %vm1665_vm3 = vcmask 523264   ;;  %vm1667_vm4 = vcmask 785408  }
  0xa2   : > { %4329 = vmatprep.subr.bf16.mxu1 %v5041_v3  ;;  %v5351_v43 = vsub.s32 0, %v5348_v42  ;;  %v5357_v45 = vsub.s32 1, %v5348_v42  ;;  %v773_v47 = vsub.s32 2, %v5348_v42  ;;  %s5837_s19 = sld [smem:[#allocation16_spill]]  ;;  %s5838_s24 = sld [smem:[#allocation29_spill]] }
  0xa3   : > { %v3984_v37 = vld [vmem:[%s5835_s23] ss:$0 sm:$0xff]  ;;  %s5839_s29 = sld [smem:[#allocation30_spill]]  ;;  %s5841_s22 = sld [smem:[#allocation31_spill]] }
  0xa4   : > { %913 = vmatpush1.bf16.msra.mxu0 %v4629_v16  ;;  %v766_v46 = vrot.slane %v761_v44, %v5351_v43  ;;  %v770_v48 = vrot.slane %v761_v44, %v5357_v45  ;;  %v774_v54 = vrot.slane %v761_v44, %v773_v47  ;;  %s5840_s26 = sld [smem:[#allocation21_spill]]  ;;  %s5047_s4 = smov [#allocation10]  }
  0xa5   : > { %4330 = vmatpush3.bf16.msra.mxu1 %v4630_v17  ;;  %914 = vmatprep.subr.bf16.mxu0 %v4631_v18  ;;  %s4959_s1 = sshll.u32 %s5047_s4, 4  ;;  %s4960_s1 = int_to_ptr.vmem [resolvable:$false] %s4959_s1 }
  0xa6   : > { %4331 = vmatprep.subr.bf16.mxu1 %v5041_v3  ;;  %s696_s0 = scalar_lea.vmem %s5836_s25, %s5315_s30  ;;  %s5045_s30 = smov 64  }
  0xa7   : > { %v5378_v62 = vld [vmem:[%s696_s0] ss:$0 sm:$0xff] }
  0xa8   : > { %915 = vmatpush1.bf16.msra.mxu0 %v4633_v19 }
  0xa9   : > { %4332 = vmatpush3.bf16.msra.mxu1 %v4634_v20  ;;  %916 = vmatprep.subr.bf16.mxu0 %v4635_v21  ;;  %s5842_s25 = smov %s5841_s22 }
  0xaa   : > { %4333 = vmatprep.subr.bf16.mxu1 %v5041_v3  ;;  %p5843_p3 = scmp.ne.s32.totalorder %s5840_s26, 0 }
  0xac   : > { %917 = vmatpush1.bf16.msra.mxu0 %v4637_v22 }
  0xad   : > { %4334 = vmatpush3.bf16.msra.mxu1 %v4638_v23  ;;  %918 = vmatprep.subr.bf16.mxu0 %v4639_v24 }
  0xae   : > { %4335 = vmatprep.subr.bf16.mxu1 %v5041_v3 }
  0xb0   : > { %919 = vmatpush1.bf16.msra.mxu0 %v4641_v26 }
  0xb1   : > { %4336 = vmatpush3.bf16.msra.mxu1 %v4642_v27  ;;  %920 = vmatprep.subr.bf16.mxu0 %v4643_v28 }
  0xb2   : > { %4337 = vmatprep.subr.bf16.mxu1 %v5041_v3 }
  0xb4   : > { %921 = vmatpush1.bf16.msra.mxu0 %v4645_v29 }
  0xb5   : > { %4338 = vmatpush3.bf16.msra.mxu1 %v4646_v30  ;;  %4373 = vmatprep.subr.mxu0 %v5041_v3 }
  0xb6   : > { %4343 = vmatprep.subr.mxu1 %v5041_v3 }
 0x12b   : > { %v702_v9 = vpop.xlane.xlu0 %701 }
 0x12c   : > { %v704_v10 = vmul.f32 0.0078125, %v702_v9 }
 0x12e   : > { %v705_v11 = vsub.f32 %v698_v0, %v704_v10 }
 0x130   : > { %v706_v12 = vmul.f32 %v705_v11, %v705_v11 }
 0x132   : > { %707 = vadd.xlane.f32.xlu0 %v706_v12 }
 0x1bf   : > { %v708_v31 = vpop.xlane.xlu0 %707 }
 0x1c0   : > { %v709_v32 = vmul.f32 0.0078125, %v708_v31 }
 0x1c2   : > { %v710_v33 = vadd.f32 1e-12, %v709_v32 }
 0x1c4   : > { %4791 = vrsqrt.f32 %v710_v33 }
 0x1ce   : > { %v4792_v34 = vpop.eup %4791 }
 0x1cf   : > { %v712_v36 = vmul.f32 %v4792_v34, %v705_v11 }
 0x1d1   : > { %v719_v38 = vmul.f32 %v3983_v35, %v712_v36 }
 0x1d3   : > { %v5340_v39 = vadd.f32 %v3984_v37, %v719_v38 }
 0x1d5   : > { %v728_v40 = vpack.c.bf16 %v5340_v39, %v5340_v39 }
 0x1d7   : > { %939 = vmatmul.mubr.bf16.vlgmr.msra.gmra.mrb[0].mxu0 %v728_v40  ;;  %4340 = vmatmul.mubr.bf16.vlgmr.msra.gmra.mrb[0].mxu1 %v728_v40 }
 0x1d8   : > { %4345 = vmatprep.mubr.msk.f32.mxu1 %vm5043_vm0, %v5041_v3  ;;  %4375 = vmatprep.mubr.msk.f32.mxu0 %vm5043_vm0, %v5041_v3 }
 0x2aa   : > { %v940_v49 = vpop.f32.mrb[0].mxu0  ;;  %v981_v50 = vpop.f32.mrb[0].mxu1 }
 0x2ab   : > { %v941_v51 = vadd.f32 %v940_v49, %v766_v46  ;;  %v942_v52 = vpop.f32.mrb[1].mxu0  ;;  %v4341_v53 = vpop.f32.mrb[1].mxu1  ;;  %v5367_v61 = vadd.f32 %v981_v50, %v774_v54 }
 0x2ac   : > { %v943_v55 = vadd.f32 %v942_v52, %v770_v48  ;;  %v944_v56 = vpop.f32.mrb[2].mxu0  ;;  %v984_v57 = vpop.f32.mrb[2].mxu1 }
 0x2ad   : > { %v945_v58 = vpop.f32.mrb[3].mxu0  ;;  %v4342_v59 = vpop.f32.mrb[3].mxu1  ;;  %v987_v60 = vmul.f32 0.17677669, %v941_v51 }
 0x2ae   : > { %1158 = vrot.lane.b32.xlu0 %v943_v55, %s5044_s28  ;;  %4344 = vmatpush3.xpose.msk.msra.mxu1 %vm994_vm1, %v943_v55 }
 0x2af   : > { %4348 = vmatprep.subr.mxu1 %v5041_v3 }
 0x2b1   : > { %4346 = vmatmul.mubr.msk.f32.vlgmr.msra.gmra.mrb[4].mxu1 %vm994_vm1, %v987_v60 }
 0x2b2   : > { %4349 = vmatpush3.msra.mxu1 %v5367_v61  ;;  %4350 = vmatprep.mubr.msk.f32.mxu1 %vm5043_vm0, %v5041_v3 }
 0x2b3   : > { %4353 = vmatprep.subr.mxu1 %v5041_v3 }
 0x320   : > { %v1159_v12 = vpop.permute.xlu0 %1158 }
 0x384   : > { %v1067_v63 = vpop.f32.mrb[4].mxu1 }
 0x385   : > { %v1068_v0 = vadd.f32 %v5378_v62, %v1067_v63  ;;  %v4347_v1 = vpop.f32.mrb[5].mxu1 }
 0x387   : > { %v1072_v2 = vsel %vm1071_vm2, %v1068_v0, -inf }
 0x388   : > { %1073 = vmax.xlane.f32.xlu1 %v1072_v2 }
 0x415   : > { %v1074_v4 = vpop.xlane.xlu1 %1073 }
 0x416   : > { %v1075_v5 = vsub.f32 %v1068_v0, %v1074_v4 }
 0x418   : > { %v1076_v6 = vmul.f32 1.442695, %v1075_v5 }
 0x41a   : > { %4793 = vpow2.f32 %v1076_v6  ;;  %v4648_v6 = vld [vmem:[%s5773_s6 + $0x8] sm:$0xff]  }
 0x424   : > { %v4794_v7 = vpop.eup %4793 }
 0x425   : > { %v1078_v8 = vsel %vm1071_vm2, %v4794_v7, 0.0 }
 0x426   : > { %1079 = vadd.xlane.f32.xlu1 %v1078_v8  ;;  %v4650_v8 = vld [vmem:[%s5773_s6 + $0x18] sm:$0xff]  }
 0x437   : > { %1156 = vrot.lane.b32.xlu1 %v987_v60, %s5044_s28 }
 0x4b3   : > { %v1080_v9 = vpop.xlane.xlu1 %1079 }
 0x4b4   : > { %4795 = vrcp.f32 %v1080_v9  ;;  %v4651_v9 = vld [vmem:[%s5773_s6 + $0x20] sm:$0xff]  }
 0x4b7   : > { %v1157_v13 = vpop.permute.xlu1 %1156 }
 0x4be   : > { %v4796_v10 = vpop.eup %4795 }
 0x4bf   : > { %v1082_v11 = vmul.f32 %v4796_v10, %v4794_v7  ;;  %v4649_v7 = vld [vmem:[%s5773_s6 + $0x10] sm:$0xff]   ;;  %v4652_v10 = vld [vmem:[%s5773_s6 + $0x28] sm:$0xff]  }
 0x4c1   : > { %4351 = vmatmul.mubr.msk.f32.vlgmr.msra.gmra.mrb[6].mxu1 %vm1071_vm2, %v1082_v11  ;;  %v4653_v11 = vld [vmem:[%s5773_s6 + $0x30] sm:$0xff]  }
 0x4c2   : > { %4354 = vmatpush3.xpose.msk.msra.mxu1 %vm994_vm1, %v1159_v12  ;;  %4355 = vmatprep.mubr.msk.f32.mxu1 %vm5043_vm0, %v5041_v3  ;;  %v4654_v12 = vld [vmem:[%s5773_s6 + $0x38] sm:$0xff]  }
 0x4c3   : > { %4358 = vmatprep.subr.mxu1 %v5041_v3 }
 0x4c5   : > { %4356 = vmatmul.mubr.msk.f32.vlgmr.msra.gmra.mrb[8].mxu1 %vm994_vm1, %v1157_v13 }
 0x4c6   : > { %4360 = vmatprep.mubr.msk.f32.mxu1 %vm5043_vm0, %v5041_v3 }
 0x594   : > { %v5392_v14 = vpop.f32.mrb[6].mxu1 }
 0x595   : > { %v4352_v15 = vpop.f32.mrb[7].mxu1 }
 0x598   : > { %v1230_v16 = vpop.f32.mrb[8].mxu1 }
 0x599   : > { %v1231_v17 = vadd.f32 %v5378_v62, %v1230_v16  ;;  %v4357_v18 = vpop.f32.mrb[9].mxu1 }
 0x59b   : > { %v1234_v19 = vsel %vm1071_vm2, %v1231_v17, -inf }
 0x59c   : > { %1235 = vmax.xlane.f32.xlu1 %v1234_v19 }
 0x5ad   : > { %1324 = vrot.lane.b32.xlu1 %v943_v55, %s5045_s30 }
 0x5b1   : > { %1322 = vrot.lane.b32.xlu1 %v987_v60, %s5045_s30 }
 0x5b5   : > { %1489 = vrot.lane.b32.xlu1 %v943_v55, %s5046_s17 }
 0x629   : > { %v1236_v20 = vpop.xlane.xlu1 %1235 }
 0x62a   : > { %v1237_v21 = vsub.f32 %v1231_v17, %v1236_v20 }
 0x62c   : > { %v1238_v22 = vmul.f32 1.442695, %v1237_v21 }
 0x62d   : > { %v1325_v23 = vpop.permute.xlu1 %1324 }
 0x62e   : > { %4797 = vpow2.f32 %v1238_v22 }
 0x631   : > { %v1323_v24 = vpop.permute.xlu1 %1322 }
 0x635   : > { %v1490_v26 = vpop.permute.xlu1 %1489 }
 0x636   : > { %4374 = vmatpush3.xpose.msk.msra.mxu0 %vm994_vm1, %v1490_v26  ;;  %v4022_v26 = vld [vmem:[%s5774_s7] ss:$0 sm:$0xff] }
 0x637   : > { %4383 = vmatprep.subr.bf16.mxu0 %v5041_v3 }
 0x638   : > { %v4798_v27 = vpop.eup %4797 }
 0x639   : > { %v1240_v28 = vsel %vm1071_vm2, %v4798_v27, 0.0 }
 0x63a   : > { %1241 = vadd.xlane.f32.xlu0 %v1240_v28 }
 0x650   : > { %1246 = vrot.lane.b32.xlu0 %v5367_v61, %s5044_s28 }
 0x654   : > { %1487 = vrot.lane.b32.xlu0 %v987_v60, %s5046_s17 }
 0x6c7   : > { %v1242_v29 = vpop.xlane.xlu0 %1241 }
 0x6c8   : > { %4799 = vrcp.f32 %v1242_v29 }
 0x6cb   : > { %v1247_v30 = vpop.permute.xlu0 %1246 }
 0x6cc   : > { %4359 = vmatpush3.msra.mxu1 %v1247_v30 }
 0x6cd   : > { %4363 = vmatprep.subr.mxu1 %v5041_v3 }
 0x6cf   : > { %v1488_v31 = vpop.permute.xlu0 %1487 }
 0x6d0   : > { %4376 = vmatmul.mubr.msk.f32.vlgmr.msra.gmra.mrb[4].mxu0 %vm994_vm1, %v1488_v31 }
 0x6d1   : > { %4399 = vmatprep.mubr.msk.bf16.mxu0 %vm5043_vm0, %v5041_v3 }
 0x6d2   : > { %v4800_v32 = vpop.eup %4799 }
 0x6d3   : > { %v1244_v33 = vmul.f32 %v4800_v32, %v4798_v27 }
 0x6d5   : > { %4361 = vmatmul.mubr.msk.f32.vlgmr.msra.gmra.mrb[10].mxu1 %vm1071_vm2, %v1244_v33  ;;  %v4657_v33 = vld [vmem:[#allocation5 + $0x4] ss:$8 sps:$4 sm:$0xff]  }
 0x6d6   : > { %4364 = vmatpush3.xpose.msk.msra.mxu1 %vm994_vm1, %v1325_v23  ;;  %4365 = vmatprep.mubr.msk.f32.mxu1 %vm5043_vm0, %v5041_v3 }
 0x6d7   : > { %4368 = vmatprep.subr.mxu1 %v5041_v3 }
 0x6d9   : > { %4366 = vmatmul.mubr.msk.f32.vlgmr.msra.gmra.mrb[12].mxu1 %vm994_vm1, %v1323_v24 }
 0x6da   : > { %4370 = vmatprep.mubr.msk.f32.mxu1 %vm5043_vm0, %v5041_v3 }
 0x7a3   : > { %v1561_v34 = vpop.f32.mrb[4].mxu0 }
 0x7a4   : > { %v1562_v35 = vadd.f32 %v5378_v62, %v1561_v34  ;;  %v4377_v36 = vpop.f32.mrb[5].mxu0  ;;  %v4660_v34 = vld [vmem:[#allocation5 + $0x14] ss:$8 sps:$4 sm:$0xff]  }
 0x7a5   : > { %v4663_v36 = vld [vmem:[#allocation5 + $0x24] ss:$8 sps:$4 sm:$0xff]  }
 0x7a6   : > { %v1565_v37 = vsel %vm1071_vm2, %v1562_v35, -inf }
 0x7a7   : > { %1566 = vmax.xlane.f32.xlu0 %v1565_v37  ;;  %v4661_v37 = vld [vmem:[#allocation5 + $0x20] ss:$8 sps:$4 sm:$0xff]  }
 0x7a8   : > { %v1318_v38 = vpop.f32.mrb[10].mxu1 }
 0x7a9   : > { %v4362_v40 = vpop.f32.mrb[11].mxu1 }
 0x7ac   : > { %v1396_v41 = vpop.f32.mrb[12].mxu1 }
 0x7ad   : > { %v1397_v44 = vadd.f32 %v5378_v62, %v1396_v41  ;;  %v4367_v46 = vpop.f32.mrb[13].mxu1 }
 0x7ae   : > { %v4666_v46 = vld [vmem:[#allocation5 + $0x34] ss:$8 sps:$4 sm:$0xff]  }
 0x7af   : > { %v1400_v48 = vsel %vm1071_vm2, %v1397_v44, -inf }
 0x7b0   : > { %1401 = vmax.xlane.f32.xlu1 %v1400_v48  ;;  %v4669_v48 = vld [vmem:[#allocation5 + $0x44] ss:$8 sps:$4 sm:$0xff]  }
 0x7c1   : > { %1411 = vrot.lane.b32.xlu1 %v5367_v61, %s5045_s30 }
 0x7c5   : > { %1653 = vrot.lane.b32.xlu1 %v1318_v38, %s5046_s17 }
 0x834   : > { %v1567_v49 = vpop.xlane.xlu0 %1566 }
 0x835   : > { %v1568_v50 = vsub.f32 %v1562_v35, %v1567_v49  ;;  %v4658_v35 = vld [vmem:[#allocation5 + $0x10] ss:$8 sps:$4 sm:$0xff]   ;;  %v4667_v49 = vld [vmem:[#allocation5 + $0x40] ss:$8 sps:$4 sm:$0xff]  }
 0x837   : > { %v1569_v51 = vmul.f32 1.442695, %v1568_v50  ;;  %v4672_v50 = vld [vmem:[#allocation5 + $0x54] ss:$8 sps:$4 sm:$0xff]  }
 0x839   : > { %4801 = vpow2.f32 %v1569_v51  ;;  %v4670_v51 = vld [vmem:[#allocation5 + $0x50] ss:$8 sps:$4 sm:$0xff]  }
 0x83d   : > { %v1402_v52 = vpop.xlane.xlu1 %1401 }
 0x83e   : > { %v1403_v53 = vsub.f32 %v1397_v44, %v1402_v52  ;;  %v4675_v52 = vld [vmem:[#allocation5 + $0x64] ss:$8 sps:$4 sm:$0xff]  }
 0x840   : > { %v1404_v54 = vmul.f32 1.442695, %v1403_v53  ;;  %v4673_v53 = vld [vmem:[#allocation5 + $0x60] ss:$8 sps:$4 sm:$0xff]  }
 0x841   : > { %v1412_v55 = vpop.permute.xlu1 %1411 }
 0x842   : > { %4803 = vpow2.f32 %v1404_v54  ;;  %4369 = vmatpush3.msra.mxu1 %v1412_v55  ;;  %v4678_v54 = vld [vmem:[#allocation5 + $0x74] ss:$8 sps:$4 sm:$0xff]   ;;  %v4676_v55 = vld [vmem:[#allocation5 + $0x70] ss:$8 sps:$4 sm:$0xff]  }
 0x843   : > { %v4802_v56 = vpop.eup %4801  ;;  %4378 = vmatprep.subr.mxu1 %v5041_v3 }
 0x844   : > { %v1571_v57 = vsel %vm1071_vm2, %v4802_v56, 0.0 }
 0x845   : > { %1572 = vadd.xlane.f32.xlu0 %v1571_v57  ;;  %v1654_v18 = vpop.permute.xlu1 %1653 }
 0x846   : > { %v1664_v20 = vsel %vm994_vm1, %v5392_v14, %v1654_v18  ;;  %v4655_v14 = vld [vmem:[#allocation5] ss:$8 sps:$4 sm:$0xff]   ;;  %v4692_v18 = vld [vmem:[#allocation7 + $0x30] sm:$0xff]  }
 0x84c   : > { %v4804_v58 = vpop.eup %4803 }
 0x84d   : > { %v1406_v59 = vsel %vm1071_vm2, %v4804_v58, 0.0 }
 0x84e   : > { %1407 = vadd.xlane.f32.xlu0 %v1406_v59 }
 0x864   : > { %1576 = vrot.lane.b32.xlu0 %v5367_v61, %s5046_s17  ;;  %v4647_v61 = vld [vmem:[%s5773_s6] sm:$0xff]  }
 0x865   : > { %4384 = vmatpush3.bf16.msra.mxu0 %v4647_v61  ;;  %v4680_v61 = vld [vmem:[#allocation7] sm:$0xff]  }
 0x866   : > { %4385 = vmatprep.subr.bf16.mxu0 %v5041_v3 }
 0x869   : > { %4386 = vmatpush3.bf16.msra.mxu0 %v4648_v6  ;;  %v4681_v6 = vld [vmem:[#allocation7 + $0x48] sm:$0xff]  }
 0x86a   : > { %4387 = vmatprep.subr.bf16.mxu0 %v5041_v3 }
 0x86d   : > { %4388 = vmatpush3.bf16.msra.mxu0 %v4649_v7  ;;  %v4682_v7 = vld [vmem:[#allocation7 + $0x8] sm:$0xff]  }
 0x86e   : > { %4389 = vmatprep.subr.bf16.mxu0 %v5041_v3 }
 0x871   : > { %4390 = vmatpush3.bf16.msra.mxu0 %v4650_v8  ;;  %v4683_v8 = vld [vmem:[#allocation7 + $0x50] sm:$0xff]  }
 0x872   : > { %4391 = vmatprep.subr.bf16.mxu0 %v5041_v3 }
 0x875   : > { %4392 = vmatpush3.bf16.msra.mxu0 %v4651_v9  ;;  %v4684_v9 = vld [vmem:[#allocation7 + $0x10] sm:$0xff]  }
 0x876   : > { %4393 = vmatprep.subr.bf16.mxu0 %v5041_v3 }
 0x879   : > { %4394 = vmatpush3.bf16.msra.mxu0 %v4652_v10  ;;  %v4685_v10 = vld [vmem:[#allocation7 + $0x58] sm:$0xff]  }
 0x87a   : > { %4395 = vmatprep.subr.bf16.mxu0 %v5041_v3 }
 0x87d   : > { %4396 = vmatpush3.bf16.msra.mxu0 %v4653_v11  ;;  %v4686_v11 = vld [vmem:[#allocation7 + $0x18] sm:$0xff]  }
 0x87e   : > { %4397 = vmatprep.subr.bf16.mxu0 %v5041_v3 }
 0x881   : > { %4398 = vmatpush3.bf16.msra.mxu0 %v4654_v12  ;;  %v4687_v12 = vld [vmem:[#allocation7 + $0x60] sm:$0xff]  }
 0x8d2   : > { %v1573_v60 = vpop.xlane.xlu0 %1572 }
 0x8db   : > { %v1408_v63 = vpop.xlane.xlu0 %1407 }
 0x8dc   : > { %4805 = vrcp.f32 %v1408_v63 }
 0x8dd   : > { %4807 = vrcp.f32 %v1573_v60  ;;  %v4031_v60 = vld [vmem:[%s5775_s8] ss:$0 sm:$0xff] }
 0x8df   : > { %v1577_v4 = vpop.permute.xlu0 %1576 }
 0x8e6   : > { %v4806_v0 = vpop.eup %4805 }
 0x8e7   : > { %v1410_v1 = vmul.f32 %v4806_v0, %v4804_v58  ;;  %v4808_v2 = vpop.eup %4807  ;;  %v4032_v0 = vld [vmem:[%s5776_s9] ss:$0 sm:$0xff] }
 0x8e8   : > { %v1575_v5 = vmul.f32 %v4808_v2, %v4802_v56 }
 0x8e9   : > { %4371 = vmatmul.mubr.msk.f32.vlgmr.msra.gmra.mrb[14].mxu1 %vm1071_vm2, %v1410_v1 }
 0x8ea   : > { %4379 = vmatpush3.msra.mxu1 %v1577_v4  ;;  %4380 = vmatprep.mubr.msk.f32.mxu1 %vm5043_vm0, %v5041_v3 }
 0x8eb   : > { %1918 = vmatprep.subr.bf16.mxu1 %v4657_v33 }
 0x8ed   : > { %4381 = vmatmul.mubr.msk.f32.vlgmr.msra.gmra.mrb[16].mxu1 %vm1071_vm2, %v1575_v5  ;;  %v4679_v5 = vld [vmem:[#allocation7 + $0x40] sm:$0xff]  }
 0x8ee   : > { %1950 = vmatprep.mubr.bf16.mxu1 %v5042_v25  ;;  %1919 = vmatpush1.bf16.msra.mxu1 %v4655_v14 }
 0x8ef   : > { %1920 = vmatprep.subr.bf16.mxu1 %v4660_v34  ;;  %4227 = vmatprep.subr.bf16.mxu0 %v4679_v5  ;;  %v4701_v5 = vld [vmem:[#allocation2 + $0xdc] ss:$12 sps:$4 sm:$0xff]  }
 0x8f2   : > { %1921 = vmatpush1.bf16.msra.mxu1 %v4658_v35 }
 0x8f3   : > { %1922 = vmatprep.subr.bf16.mxu1 %v4663_v36 }
 0x8f6   : > { %1923 = vmatpush1.bf16.msra.mxu1 %v4661_v37 }
 0x8f7   : > { %1924 = vmatprep.subr.bf16.mxu1 %v4666_v46 }
 0x9bc   : > { %v1483_v13 = vpop.f32.mrb[14].mxu1 }
 0x9bd   : > { %1657 = vrot.lane.b32.xlu1 %v1483_v13, %s5045_s30  ;;  %v4372_v15 = vpop.f32.mrb[15].mxu1  ;;  %v4688_v13 = vld [vmem:[#allocation7 + $0x20] sm:$0xff]  }
 0x9be   : > { %v4689_v15 = vld [vmem:[#allocation7 + $0x68] sm:$0xff]  }
 0x9c0   : > { %v1648_v16 = vpop.f32.mrb[16].mxu1 }
 0x9c1   : > { %1661 = vrot.lane.b32.xlu1 %v1648_v16, %s5044_s28  ;;  %v4382_v17 = vpop.f32.mrb[17].mxu1  ;;  %v4690_v16 = vld [vmem:[#allocation7 + $0x28] sm:$0xff]  }
 0x9c2   : > { %v4691_v17 = vld [vmem:[#allocation7 + $0x70] sm:$0xff]  }
 0xa2f   : > { %v1658_v19 = vpop.permute.xlu1 %1657 }
 0xa30   : > { %v1666_v21 = vsel %vm1665_vm3, %v1664_v20, %v1658_v19  ;;  %v4693_v19 = vld [vmem:[#allocation7 + $0x78] sm:$0xff]  }
 0xa31   : > { %v4694_v20 = vld [vmem:[#allocation7 + $0x38] sm:$0xff]  }
 0xa33   : > { %v1662_v22 = vpop.permute.xlu1 %1661 }
 0xa34   : > { %v1668_v23 = vsel %vm1667_vm4, %v1666_v21, %v1662_v22  ;;  %v1826_v21 = vld [vmem:[%s5778_s11] sm:$0x3] }
 0xa35   : > { %v1669_v24 = vpack.c.bf16 %v1668_v23, %v1668_v23  ;;  %v1831_v22 = vrot.slane %v1826_v21, %v5351_v43  ;;  %v1835_v23 = vrot.slane %v1826_v21, %v5357_v45  ;;  %v4715_v21 = vld [vmem:[#allocation2 + $0x138] ss:$12 sps:$4 sm:$0xff]  }
 0xa37   : > { %4400 = vmatmul.mubr.bf16.vlgmr.msra.gmra.mrb[8].mxu0 %v1669_v24 }
 0xa38   : > { %4228 = vmatpush3.bf16.msra.mxu0 %v4680_v61  ;;  %v4702_v61 = vld [vmem:[#allocation2 + $0xe0] ss:$12 sps:$4 sm:$0xff]  }
 0xa39   : > { %4229 = vmatprep.subr.bf16.mxu0 %v4681_v6  ;;  %v4699_v6 = vld [vmem:[#allocation2 + $0xd8] ss:$12 sps:$4 sm:$0xff]  }
 0xa3c   : > { %4230 = vmatpush3.bf16.msra.mxu0 %v4682_v7  ;;  %v4705_v7 = vld [vmem:[#allocation2 + $0xf4] ss:$12 sps:$4 sm:$0xff]  }
 0xa3d   : > { %4231 = vmatprep.subr.bf16.mxu0 %v4683_v8  ;;  %v4703_v8 = vld [vmem:[#allocation2 + $0xf0] ss:$12 sps:$4 sm:$0xff]  }
 0xa40   : > { %4232 = vmatpush3.bf16.msra.mxu0 %v4684_v9 }
 0xa41   : > { %4233 = vmatprep.subr.bf16.mxu0 %v4685_v10 }
 0xa44   : > { %4234 = vmatpush3.bf16.msra.mxu0 %v4686_v11 }
 0xa45   : > { %4235 = vmatprep.subr.bf16.mxu0 %v4687_v12  ;;  %v4706_v12 = vld [vmem:[#allocation2 + $0xf8] ss:$12 sps:$4 sm:$0xff]  }
 0xa48   : > { %4236 = vmatpush3.bf16.msra.mxu0 %v4688_v13  ;;  %v4709_v13 = vld [vmem:[#allocation2 + $0x10c] ss:$12 sps:$4 sm:$0xff]  }
 0xa49   : > { %4237 = vmatprep.subr.bf16.mxu0 %v4689_v15  ;;  %v4707_v15 = vld [vmem:[#allocation2 + $0x108] ss:$12 sps:$4 sm:$0xff]  }
 0xa4c   : > { %4238 = vmatpush3.bf16.msra.mxu0 %v4690_v16  ;;  %v4710_v16 = vld [vmem:[#allocation2 + $0x110] ss:$12 sps:$4 sm:$0xff]  }
 0xa4d   : > { %4239 = vmatprep.subr.bf16.mxu0 %v4691_v17  ;;  %v4713_v17 = vld [vmem:[#allocation2 + $0x124] ss:$12 sps:$4 sm:$0xff]  }
 0xa50   : > { %4240 = vmatpush3.bf16.msra.mxu0 %v4692_v18  ;;  %v4711_v18 = vld [vmem:[#allocation2 + $0x120] ss:$12 sps:$4 sm:$0xff]  }
 0xa51   : > { %4241 = vmatprep.subr.bf16.mxu0 %v4693_v19  ;;  %v4714_v19 = vld [vmem:[#allocation2 + $0x128] ss:$12 sps:$4 sm:$0xff]  }
 0xa54   : > { %4242 = vmatpush3.bf16.msra.mxu0 %v4694_v20  ;;  %v4717_v20 = vld [vmem:[#allocation2 + $0x13c] ss:$12 sps:$4 sm:$0xff]  }
 0xa55   : > { %4403 = vmatprep.subr.bf16.mxu0 %v5041_v3 }
 0xb0a   : > { %v1775_v27 = vpop.f32.mrb[8].mxu0 }
 0xb0b   : > { %v1776_v28 = vadd.f32 %v4022_v26, %v1775_v27  ;;  %v4401_v29 = vpop.f32.mrb[9].mxu0 }
 0xb0c   : > { %v1778_v30 = vpop.f32.mrb[10].mxu0 }
 0xb0d   : > { %v4402_v31 = vpop.f32.mrb[11].mxu0  ;;  %v1781_v32 = vadd.f32 %v1776_v28, %v5340_v39  ;;  %v4664_v39 = vld [vmem:[#allocation5 + $0x30] ss:$8 sps:$4 sm:$0xff]  }
 0xb0e   : > { %1925 = vmatpush1.bf16.msra.mxu1 %v4664_v39 }
 0xb0f   : > { %1784 = vadd.xlane.f32.xlu0 %v1781_v32  ;;  %1926 = vmatprep.subr.bf16.mxu1 %v4669_v48 }
 0xb12   : > { %1927 = vmatpush1.bf16.msra.mxu1 %v4667_v49 }
 0xb13   : > { %1928 = vmatprep.subr.bf16.mxu1 %v4672_v50 }
 0xb16   : > { %1929 = vmatpush1.bf16.msra.mxu1 %v4670_v51 }
 0xb17   : > { %1930 = vmatprep.subr.bf16.mxu1 %v4675_v52 }
 0xb1a   : > { %1931 = vmatpush1.bf16.msra.mxu1 %v4673_v53 }
 0xb1b   : > { %1932 = vmatprep.subr.bf16.mxu1 %v4678_v54 }
 0xb1e   : > { %1933 = vmatpush1.bf16.msra.mxu1 %v4676_v55  ;;  %v4049_v55 = vld [vmem:[%s5780_s13] ss:$0 sm:$0xff] }
 0xb9c   : > { %v1785_v38 = vpop.xlane.xlu0 %1784 }
 0xb9d   : > { %v1786_v40 = vmul.f32 0.0078125, %v1785_v38 }
 0xb9f   : > { %v1787_v41 = vsub.f32 %v1781_v32, %v1786_v40 }
 0xba1   : > { %v1788_v44 = vmul.f32 %v1787_v41, %v1787_v41 }
 0xba3   : > { %1789 = vadd.xlane.f32.xlu1 %v1788_v44 }
 0xc30   : > { %v1790_v56 = vpop.xlane.xlu1 %1789 }
 0xc31   : > { %v1791_v57 = vmul.f32 0.0078125, %v1790_v56 }
 0xc33   : > { %v1792_v58 = vadd.f32 1e-12, %v1791_v57 }
 0xc35   : > { %4809 = vrsqrt.f32 %v1792_v58 }
 0xc3f   : > { %v4810_v59 = vpop.eup %4809 }
 0xc40   : > { %v1794_v63 = vmul.f32 %v4810_v59, %v1787_v41 }
 0xc42   : > { %v1801_v1 = vmul.f32 %v4031_v60, %v1794_v63 }
 0xc44   : > { %v5481_v2 = vadd.f32 %v4032_v0, %v1801_v1  ;;  %v4695_v0 = vld [vmem:[#allocation2 + $0xc0] ss:$12 sps:$4 sm:$0xff]   ;;  %v4697_v1 = vld [vmem:[#allocation2 + $0xc4] ss:$12 sps:$4 sm:$0xff]  }
 0xc45   : > { %2362 = vmatprep.subr.bf16.mxu1 %v4697_v1 }
 0xc46   : > { %v1809_v4 = vpack.c.bf16 %v5481_v2, %v5481_v2 }
 0xc48   : > { %1951 = vmatmul.mubr.bf16.vlgmr.msra.gmra.mrb[20].mxu1 %v1809_v4  ;;  %v4698_v4 = vld [vmem:[#allocation2 + $0xc8] ss:$12 sps:$4 sm:$0xff]  }
 0xc49   : > { %2394 = vmatprep.mubr.bf16.mxu1 %v5042_v25  ;;  %2363 = vmatpush1.bf16.msra.mxu1 %v4695_v0 }
 0xc4a   : > { %2364 = vmatprep.subr.bf16.mxu1 %v4701_v5 }
 0xc4d   : > { %2365 = vmatpush1.bf16.msra.mxu1 %v4699_v6 }
 0xc4e   : > { %2366 = vmatprep.subr.bf16.mxu1 %v4705_v7 }
 0xc51   : > { %2367 = vmatpush1.bf16.msra.mxu1 %v4703_v8 }
 0xc52   : > { %2368 = vmatprep.subr.bf16.mxu1 %v4709_v13 }
 0xc55   : > { %2369 = vmatpush1.bf16.msra.mxu1 %v4707_v15 }
 0xc56   : > { %2370 = vmatprep.subr.bf16.mxu1 %v4713_v17 }
 0xc59   : > { %2371 = vmatpush1.bf16.msra.mxu1 %v4711_v18 }
 0xc5a   : > { %2372 = vmatprep.subr.bf16.mxu1 %v4717_v20 }
 0xc5d   : > { %2373 = vmatpush1.bf16.msra.mxu1 %v4715_v21 }
 0xd1b   : > { %v1952_v24 = vpop.f32.mrb[20].mxu1 }
 0xd1c   : > { %v1953_v26 = vadd.f32 %v1952_v24, %v1831_v22  ;;  %v1954_v27 = vpop.f32.mrb[21].mxu1  ;;  %v4718_v22 = vld [vmem:[#allocation2 + $0x140] ss:$12 sps:$4 sm:$0xff]   ;;  %v4719_v24 = vld [vmem:[#allocation2 + $0x150] ss:$12 sps:$4 sm:$0xff]  }
 0xd1d   : > { %v1955_v28 = vadd.f32 %v1954_v27, %v1835_v23  ;;  %v1956_v29 = vpop.f32.mrb[22].mxu1  ;;  %v4721_v23 = vld [vmem:[#allocation2 + $0x154] ss:$12 sps:$4 sm:$0xff]   ;;  %v4725_v27 = vld [vmem:[#allocation2 + $0x16c] ss:$12 sps:$4 sm:$0xff]  }
 0xd1e   : > { %v1959_v30 = vmul.f32 %v1953_v26, %v1953_v26  ;;  %v1957_v31 = vpop.f32.mrb[23].mxu1  ;;  %2374 = vmatprep.subr.bf16.mxu1 %v4721_v23  ;;  %v4726_v29 = vld [vmem:[#allocation2 + $0x170] ss:$12 sps:$4 sm:$0xff]  }
 0xd1f   : > { %v1960_v32 = vmul.f32 %v1955_v28, %v1955_v28  ;;  %2375 = vmatpush1.bf16.msra.mxu1 %v4719_v24 }
 0xd20   : > { %v1961_v14 = vmul.f32 %v1959_v30, %v1953_v26  ;;  %2376 = vmatprep.subr.bf16.mxu1 %v4725_v27 }
 0xd21   : > { %v1962_v33 = vmul.f32 %v1960_v32, %v1955_v28 }
 0xd22   : > { %v1963_v34 = vmul.f32 0.044715, %v1961_v14 }
 0xd23   : > { %v1964_v35 = vmul.f32 0.044715, %v1962_v33  ;;  %v4066_v33 = vld [vmem:[%s5781_s14] ss:$0 sm:$0xff] }
 0xd24   : > { %v1965_v36 = vadd.f32 %v1963_v34, %v1953_v26 }
 0xd25   : > { %v1966_v37 = vadd.f32 %v1964_v35, %v1955_v28  ;;  %v4067_v35 = vld [vmem:[%s5782_s15] ss:$0 sm:$0xff] }
 0xd26   : > { %v1967_v38 = vmul.f32 0.7978846, %v1965_v36 }
 0xd27   : > { %v1968_v40 = vmul.f32 0.7978846, %v1966_v37 }
 0xd28   : > { %4811 = vtanh.f32 %v1967_v38 }
 0xd29   : > { %4813 = vtanh.f32 %v1968_v40  ;;  %v4068_v40 = vld [vmem:[%s5772_s5 + $0x3] sm:$0x7] }
 0xd32   : > { %v4812_v41 = vpop.eup %4811 }
 0xd33   : > { %v4814_v44 = vpop.eup %4813  ;;  %v1971_v46 = vadd.f32 1.0, %v4812_v41  ;;  %v2222_v41 = vrot.slane %v4068_v40, %v5351_v43 }
 0xd34   : > { %v1972_v39 = vadd.f32 1.0, %v4814_v44  ;;  %v2226_v44 = vrot.slane %v4068_v40, %v5357_v45 }
 0xd35   : > { %v1973_v48 = vmul.f32 0.5, %v1971_v46 }
 0xd36   : > { %v1974_v49 = vmul.f32 0.5, %v1972_v39 }
 0xd37   : > { %v1975_v50 = vmul.f32 %v1973_v48, %v1953_v26  ;;  %v4722_v26 = vld [vmem:[#allocation2 + $0x158] ss:$12 sps:$4 sm:$0xff]  }
 0xd38   : > { %v1976_v51 = vmul.f32 %v1974_v49, %v1955_v28  ;;  %v4723_v28 = vld [vmem:[#allocation2 + $0x168] ss:$12 sps:$4 sm:$0xff]  }
 0xd39   : > { %v1977_v53 = vpack.c.bf16 %v1975_v50, %v1975_v50  ;;  %2377 = vmatpush1.bf16.msra.mxu1 %v4723_v28 }
 0xd3a   : > { %v1978_v52 = vpack.c.bf16 %v1976_v51, %v1976_v51  ;;  %4423 = vmatprep.subr.mxu1 %v5041_v3  ;;  %v2230_v51 = vrot.slane %v4068_v40, %v773_v47 }
 0xd3c   : > { %2146 = vmatprep.mubr.bf16.mxu0 %v1978_v52 }
 0xd3d   : > { %2147 = vmatmul.mubr.bf16.vlgmr.msra.gmra.mrb[12].mxu0 %v1977_v53 }
 0xd3e   : > { %4419 = vmatprep.mubr.msk.bf16.mxu0 %vm5043_vm0, %v5041_v3  ;;  %4404 = vmatpush3.bf16.msra.mxu0 %v4698_v4 }
 0xd3f   : > { %4405 = vmatprep.subr.bf16.mxu0 %v5041_v3 }
 0xd42   : > { %4406 = vmatpush3.bf16.msra.mxu0 %v4702_v61 }
 0xd43   : > { %4407 = vmatprep.subr.bf16.mxu0 %v5041_v3 }
 0xd46   : > { %4408 = vmatpush3.bf16.msra.mxu0 %v4706_v12 }
 0xd47   : > { %4409 = vmatprep.subr.bf16.mxu0 %v5041_v3 }
 0xd4a   : > { %4410 = vmatpush3.bf16.msra.mxu0 %v4710_v16 }
 0xd4b   : > { %4411 = vmatprep.subr.bf16.mxu0 %v5041_v3 }
 0xd4e   : > { %4412 = vmatpush3.bf16.msra.mxu0 %v4714_v19 }
 0xd4f   : > { %4413 = vmatprep.subr.bf16.mxu0 %v5041_v3 }
 0xd52   : > { %4414 = vmatpush3.bf16.msra.mxu0 %v4718_v22 }
 0xd53   : > { %4415 = vmatprep.subr.bf16.mxu0 %v5041_v3 }
 0xd56   : > { %4416 = vmatpush3.bf16.msra.mxu0 %v4722_v26 }
 0xd57   : > { %4417 = vmatprep.subr.bf16.mxu0 %v5041_v3 }
 0xd5a   : > { %4418 = vmatpush3.bf16.msra.mxu0 %v4726_v29 }
 0xd5b   : > { %4463 = vmatprep.subr.bf16.mxu0 %v5041_v3 }
 0xe10   : > { %v4243_v54 = vpop.f32.mrb[12].mxu0 }
 0xe11   : > { %v4244_v56 = vpop.f32.mrb[13].mxu0 }
 0xe12   : > { %v4245_v57 = vadd.f32 %v4244_v56, %v4243_v54  ;;  %v4246_v58 = vpop.f32.mrb[14].mxu0 }
 0xe13   : > { %v4247_v59 = vpop.f32.mrb[15].mxu0 }
 0xe14   : > { %v2149_v60 = vadd.f32 %v4245_v57, %v4049_v55 }
 0xe16   : > { %v2154_v63 = vadd.f32 %v2149_v60, %v5481_v2 }
 0xe18   : > { %2157 = vadd.xlane.f32.xlu0 %v2154_v63 }
 0xea5   : > { %v2158_v2 = vpop.xlane.xlu0 %2157 }
 0xea6   : > { %v2159_v9 = vmul.f32 0.0078125, %v2158_v2 }
 0xea8   : > { %v2160_v10 = vsub.f32 %v2154_v63, %v2159_v9 }
 0xeaa   : > { %v2161_v11 = vmul.f32 %v2160_v10, %v2160_v10 }
 0xeac   : > { %2162 = vadd.xlane.f32.xlu0 %v2161_v11 }
 0xf39   : > { %v2163_v30 = vpop.xlane.xlu0 %2162 }
 0xf3a   : > { %v2164_v31 = vmul.f32 0.0078125, %v2163_v30 }
 0xf3c   : > { %v2165_v32 = vadd.f32 1e-12, %v2164_v31 }
 0xf3e   : > { %4815 = vrsqrt.f32 %v2165_v32 }
 0xf48   : > { %v4816_v14 = vpop.eup %4815 }
 0xf49   : > { %v2167_v34 = vmul.f32 %v4816_v14, %v2160_v10 }
 0xf4b   : > { %v2174_v36 = vmul.f32 %v4066_v33, %v2167_v34 }
 0xf4d   : > { %v5513_v37 = vadd.f32 %v4067_v35, %v2174_v36 }
 0xf4f   : > { %v2182_v38 = vpack.c.bf16 %v5513_v37, %v5513_v37 }
 0xf51   : > { %2395 = vmatmul.mubr.bf16.vlgmr.msra.gmra.mrb[24].mxu1 %v2182_v38  ;;  %4420 = vmatmul.mubr.bf16.vlgmr.msra.gmra.mrb[16].mxu0 %v2182_v38 }
 0xf52   : > { %4425 = vmatprep.mubr.msk.f32.mxu1 %vm5043_vm0, %v5041_v3  ;;  %4479 = vmatprep.mubr.msk.bf16.mxu0 %vm5043_vm0, %v5041_v3 }
0x1024   : > { %v2396_v46 = vpop.f32.mrb[24].mxu1  ;;  %v2437_v39 = vpop.f32.mrb[16].mxu0 }
0x1025   : > { %v2397_v48 = vadd.f32 %v2396_v46, %v2222_v41  ;;  %v2398_v49 = vpop.f32.mrb[25].mxu1  ;;  %v4421_v50 = vpop.f32.mrb[17].mxu0  ;;  %v5535_v58 = vadd.f32 %v2437_v39, %v2230_v51 }
0x1026   : > { %v5528_v52 = vadd.f32 %v2398_v49, %v2226_v44  ;;  %v2400_v53 = vpop.f32.mrb[26].mxu1  ;;  %v2440_v54 = vpop.f32.mrb[18].mxu0 }
0x1027   : > { %v2401_v55 = vpop.f32.mrb[27].mxu1  ;;  %v4422_v56 = vpop.f32.mrb[19].mxu0  ;;  %v5532_v57 = vmul.f32 0.17677669, %v2397_v48 }
0x1028   : > { %4424 = vmatpush3.xpose.msk.msra.mxu1 %vm994_vm1, %v5528_v52 }
0x1029   : > { %4428 = vmatprep.subr.mxu1 %v5041_v3 }
0x102b   : > { %4426 = vmatmul.mubr.msk.f32.vlgmr.msra.gmra.mrb[18].mxu1 %vm994_vm1, %v5532_v57 }
0x102c   : > { %4429 = vmatpush3.msra.mxu1 %v5535_v58  ;;  %4430 = vmatprep.mubr.msk.f32.mxu1 %vm5043_vm0, %v5041_v3 }
0x102d   : > { %4433 = vmatprep.subr.mxu1 %v5041_v3 }
0x10fe   : > { %v2516_v42 = vpop.f32.mrb[18].mxu1 }
0x10ff   : > { %v2517_v47 = vadd.f32 %v5378_v62, %v2516_v42  ;;  %v4427_v59 = vpop.f32.mrb[19].mxu1 }
0x1101   : > { %v2520_v60 = vsel %vm1071_vm2, %v2517_v47, -inf }
0x1102   : > { %2521 = vmax.xlane.f32.xlu0 %v2520_v60 }
0x1118   : > { %2606 = vrot.lane.b32.xlu0 %v5528_v52, %s5044_s28 }
0x118f   : > { %v2522_v63 = vpop.xlane.xlu0 %2521 }
0x1190   : > { %v2523_v0 = vsub.f32 %v2517_v47, %v2522_v63 }
0x1192   : > { %v2524_v1 = vmul.f32 1.442695, %v2523_v0  ;;  %v4728_v0 = vld [vmem:[%s5773_s6 + $0x48] sm:$0xff]  }
0x1193   : > { %v2607_v8 = vpop.permute.xlu0 %2606 }
0x1194   : > { %4817 = vpow2.f32 %v2524_v1  ;;  %v4729_v1 = vld [vmem:[%s5773_s6 + $0x50] sm:$0xff]  }
0x119e   : > { %v4818_v4 = vpop.eup %4817 }
0x119f   : > { %v2526_v5 = vsel %vm1071_vm2, %v4818_v4, 0.0 }
0x11a0   : > { %2527 = vadd.xlane.f32.xlu1 %v2526_v5  ;;  %v4732_v5 = vld [vmem:[%s5773_s6 + $0x68] sm:$0xff]  }
0x11b1   : > { %2604 = vrot.lane.b32.xlu1 %v5532_v57, %s5044_s28 }
0x122d   : > { %v2528_v61 = vpop.xlane.xlu1 %2527 }
0x122e   : > { %4819 = vrcp.f32 %v2528_v61  ;;  %v4733_v61 = vld [vmem:[%s5773_s6 + $0x70] sm:$0xff]  }
0x1231   : > { %v2605_v2 = vpop.permute.xlu1 %2604 }
0x1238   : > { %v4820_v6 = vpop.eup %4819 }
0x1239   : > { %v2530_v7 = vmul.f32 %v4820_v6, %v4818_v4  ;;  %v4731_v4 = vld [vmem:[%s5773_s6 + $0x60] sm:$0xff]   ;;  %v4734_v6 = vld [vmem:[%s5773_s6 + $0x78] sm:$0xff]  }
0x123b   : > { %4431 = vmatmul.mubr.msk.f32.vlgmr.msra.gmra.mrb[28].mxu1 %vm1071_vm2, %v2530_v7 }
0x123c   : > { %4434 = vmatpush3.xpose.msk.msra.mxu1 %vm994_vm1, %v2607_v8  ;;  %4435 = vmatprep.mubr.msk.f32.mxu1 %vm5043_vm0, %v5041_v3 }
0x123d   : > { %4438 = vmatprep.subr.mxu1 %v5041_v3 }
0x123f   : > { %4436 = vmatmul.mubr.msk.f32.vlgmr.msra.gmra.mrb[30].mxu1 %vm994_vm1, %v2605_v2 }
0x1240   : > { %4440 = vmatprep.mubr.msk.f32.mxu1 %vm5043_vm0, %v5041_v3 }
0x130e   : > { %v5558_v9 = vpop.f32.mrb[28].mxu1 }
0x130f   : > { %v4432_v10 = vpop.f32.mrb[29].mxu1 }
0x1312   : > { %v2678_v11 = vpop.f32.mrb[30].mxu1 }
0x1313   : > { %v2679_v12 = vadd.f32 %v5378_v62, %v2678_v11  ;;  %v4437_v13 = vpop.f32.mrb[31].mxu1 }
0x1315   : > { %v2682_v15 = vsel %vm1071_vm2, %v2679_v12, -inf }
0x1316   : > { %2683 = vmax.xlane.f32.xlu1 %v2682_v15 }
0x1327   : > { %2772 = vrot.lane.b32.xlu1 %v5528_v52, %s5045_s30 }
0x132b   : > { %2770 = vrot.lane.b32.xlu1 %v5532_v57, %s5045_s30 }
0x13a3   : > { %v2684_v16 = vpop.xlane.xlu1 %2683 }
0x13a4   : > { %v2685_v17 = vsub.f32 %v2679_v12, %v2684_v16 }
0x13a6   : > { %v2686_v18 = vmul.f32 1.442695, %v2685_v17  ;;  %v4122_v17 = vld [vmem:[%s5774_s7 + $0x1] ss:$0 sm:$0xff] }
0x13a7   : > { %v2773_v24 = vpop.permute.xlu1 %2772 }
0x13a8   : > { %4821 = vpow2.f32 %v2686_v18 }
0x13ab   : > { %v2771_v27 = vpop.permute.xlu1 %2770 }
0x13b2   : > { %v4822_v19 = vpop.eup %4821 }
0x13b3   : > { %v2688_v20 = vsel %vm1071_vm2, %v4822_v19, 0.0 }
0x13b4   : > { %2689 = vadd.xlane.f32.xlu0 %v2688_v20 }
0x13ca   : > { %2694 = vrot.lane.b32.xlu0 %v5535_v58, %s5044_s28 }
0x1441   : > { %v2690_v21 = vpop.xlane.xlu0 %2689 }
0x1442   : > { %4823 = vrcp.f32 %v2690_v21 }
0x1445   : > { %v2695_v22 = vpop.permute.xlu0 %2694 }
0x1446   : > { %4439 = vmatpush3.msra.mxu1 %v2695_v22 }
0x1447   : > { %4443 = vmatprep.subr.mxu1 %v5041_v3 }
0x144c   : > { %v4824_v23 = vpop.eup %4823 }
0x144d   : > { %v2692_v26 = vmul.f32 %v4824_v23, %v4822_v19 }
0x144f   : > { %4441 = vmatmul.mubr.msk.f32.vlgmr.msra.gmra.mrb[32].mxu1 %vm1071_vm2, %v2692_v26  ;;  %v4740_v26 = vld [vmem:[#allocation5 + $0x94] ss:$8 sps:$4 sm:$0xff]  }
0x1450   : > { %4444 = vmatpush3.xpose.msk.msra.mxu1 %vm994_vm1, %v2773_v24  ;;  %4445 = vmatprep.mubr.msk.f32.mxu1 %vm5043_vm0, %v5041_v3  ;;  %v4737_v24 = vld [vmem:[#allocation5 + $0x84] ss:$8 sps:$4 sm:$0xff]  }
0x1451   : > { %4448 = vmatprep.subr.mxu1 %v5041_v3 }
0x1453   : > { %4446 = vmatmul.mubr.msk.f32.vlgmr.msra.gmra.mrb[34].mxu1 %vm994_vm1, %v2771_v27  ;;  %v4738_v27 = vld [vmem:[#allocation5 + $0x90] ss:$8 sps:$4 sm:$0xff]  }
0x1454   : > { %4450 = vmatprep.mubr.msk.f32.mxu1 %vm5043_vm0, %v5041_v3 }
0x1522   : > { %v2766_v28 = vpop.f32.mrb[32].mxu1 }
0x1523   : > { %v4442_v29 = vpop.f32.mrb[33].mxu1 }
0x1524   : > { %v4741_v29 = vld [vmem:[#allocation5 + $0xa0] ss:$8 sps:$4 sm:$0xff]  }
0x1526   : > { %v2844_v30 = vpop.f32.mrb[34].mxu1 }
0x1527   : > { %v2845_v31 = vadd.f32 %v5378_v62, %v2844_v30  ;;  %v4447_v32 = vpop.f32.mrb[35].mxu1 }
0x1529   : > { %v2848_v14 = vsel %vm1071_vm2, %v2845_v31, -inf }
0x152a   : > { %2849 = vmax.xlane.f32.xlu1 %v2848_v14 }
0x153b   : > { %2937 = vrot.lane.b32.xlu1 %v5528_v52, %s5046_s17 }
0x153f   : > { %2935 = vrot.lane.b32.xlu1 %v5532_v57, %s5046_s17 }
0x15b7   : > { %v2850_v33 = vpop.xlane.xlu1 %2849 }
0x15b8   : > { %v2851_v34 = vsub.f32 %v2845_v31, %v2850_v33  ;;  %v4746_v33 = vld [vmem:[#allocation5 + $0xb4] ss:$8 sps:$4 sm:$0xff]  }
0x15ba   : > { %v2852_v35 = vmul.f32 1.442695, %v2851_v34  ;;  %v4749_v34 = vld [vmem:[#allocation5 + $0xc4] ss:$8 sps:$4 sm:$0xff]  }
0x15bb   : > { %v2938_v46 = vpop.permute.xlu1 %2937 }
0x15bc   : > { %4825 = vpow2.f32 %v2852_v35  ;;  %v4747_v35 = vld [vmem:[#allocation5 + $0xc0] ss:$8 sps:$4 sm:$0xff]  }
0x15bf   : > { %v2936_v48 = vpop.permute.xlu1 %2935 }
0x15c6   : > { %v4826_v36 = vpop.eup %4825 }
0x15c7   : > { %v2854_v38 = vsel %vm1071_vm2, %v4826_v36, 0.0 }
0x15c8   : > { %2855 = vadd.xlane.f32.xlu0 %v2854_v38  ;;  %v4750_v38 = vld [vmem:[#allocation5 + $0xd0] ss:$8 sps:$4 sm:$0xff]  }
0x15de   : > { %2859 = vrot.lane.b32.xlu0 %v5535_v58, %s5045_s30 }
0x1655   : > { %v2856_v40 = vpop.xlane.xlu0 %2855 }
0x1656   : > { %4827 = vrcp.f32 %v2856_v40  ;;  %v4755_v40 = vld [vmem:[#allocation5 + $0xe4] ss:$8 sps:$4 sm:$0xff]  }
0x1659   : > { %v2860_v41 = vpop.permute.xlu0 %2859 }
0x165a   : > { %4449 = vmatpush3.msra.mxu1 %v2860_v41  ;;  %v4753_v41 = vld [vmem:[#allocation5 + $0xe0] ss:$8 sps:$4 sm:$0xff]  }
0x165b   : > { %4453 = vmatprep.subr.mxu1 %v5041_v3 }
0x1660   : > { %v4828_v44 = vpop.eup %4827 }
0x1661   : > { %v2858_v39 = vmul.f32 %v4828_v44, %v4826_v36  ;;  %v4752_v36 = vld [vmem:[#allocation5 + $0xd4] ss:$8 sps:$4 sm:$0xff]  }
0x1662   : > { %v4758_v44 = vld [vmem:[#allocation5 + $0xf4] ss:$8 sps:$4 sm:$0xff]  }
0x1663   : > { %4451 = vmatmul.mubr.msk.f32.vlgmr.msra.gmra.mrb[36].mxu1 %vm1071_vm2, %v2858_v39 }
0x1664   : > { %4454 = vmatpush3.xpose.msk.msra.mxu1 %vm994_vm1, %v2938_v46  ;;  %4455 = vmatprep.mubr.msk.f32.mxu1 %vm5043_vm0, %v5041_v3  ;;  %v4756_v46 = vld [vmem:[#allocation5 + $0xf0] ss:$8 sps:$4 sm:$0xff]  }
0x1665   : > { %4458 = vmatprep.subr.mxu1 %v5041_v3 }
0x1667   : > { %4456 = vmatmul.mubr.msk.f32.vlgmr.msra.gmra.mrb[38].mxu1 %vm994_vm1, %v2936_v48 }
0x1668   : > { %4460 = vmatprep.mubr.msk.f32.mxu1 %vm5043_vm0, %v5041_v3 }
0x1736   : > { %v2931_v49 = vpop.f32.mrb[36].mxu1 }
0x1737   : > { %v4452_v50 = vpop.f32.mrb[37].mxu1 }
0x173a   : > { %v3009_v51 = vpop.f32.mrb[38].mxu1 }
0x173b   : > { %v3010_v52 = vadd.f32 %v5378_v62, %v3009_v51  ;;  %v4457_v53 = vpop.f32.mrb[39].mxu1  ;;  %v4133_v51 = vld [vmem:[%s5775_s8 + $0x1] ss:$0 sm:$0xff] }
0x173c   : > { %v4134_v53 = vld [vmem:[%s5776_s9 + $0x1] ss:$0 sm:$0xff] }
0x173d   : > { %v3013_v54 = vsel %vm1071_vm2, %v3010_v52, -inf }
0x173e   : > { %3014 = vmax.xlane.f32.xlu0 %v3013_v54 }
0x1754   : > { %3024 = vrot.lane.b32.xlu0 %v5535_v58, %s5046_s17  ;;  %v4727_v58 = vld [vmem:[%s5773_s6 + $0x40] sm:$0xff]  }
0x1755   : > { %4464 = vmatpush3.bf16.msra.mxu0 %v4727_v58  ;;  %v4766_v58 = vld [vmem:[#allocation7 + $0x98] sm:$0xff]  }
0x1756   : > { %4465 = vmatprep.subr.bf16.mxu0 %v5041_v3 }
0x1758   : > { %3105 = vrot.lane.b32.xlu0 %v2931_v49, %s5045_s30  ;;  %s688_s30 = sand.u32 1, %s5837_s19  }
0x1759   : > { %4466 = vmatpush3.bf16.msra.mxu0 %v4728_v0  ;;  %v4767_v0 = vld [vmem:[#allocation7 + $0xe0] sm:$0xff]   ;;  %s689_s23 = scalar_lea.vmem [#allocation10], %s688_s30  ;;  %s3853_s19 = scalar_lea.sflag [#allocation4], %s688_s30 }
0x175a   : > { %4467 = vmatprep.subr.bf16.mxu0 %v5041_v3  ;;  %s3865_s21 = sshll.u32 %s689_s23, 4  ;;  %s5727_s21 = int_to_ptr.vmem [resolvable:$true] %s3865_s21 }
0x175b   : > { %p4962_p8 = scmp.lt.s32.totalorder %s5727_s21, %s4960_s1 }
0x175d   : > { %4468 = vmatpush3.bf16.msra.mxu0 %v4729_v1  ;;  %v4768_v1 = vld [vmem:[#allocation7 + $0xa0] sm:$0xff]  }
0x175e   : > { %4469 = vmatprep.subr.bf16.mxu0 %v5041_v3 }
0x17cb   : > { %v3015_v55 = vpop.xlane.xlu0 %3014 }
0x17cc   : > { %v3016_v56 = vsub.f32 %v3010_v52, %v3015_v55 }
0x17ce   : > { %v3017_v57 = vmul.f32 1.442695, %v3016_v56 }
0x17cf   : > { %v3025_v42 = vpop.permute.xlu0 %3024 }
0x17d0   : > { %4829 = vpow2.f32 %v3017_v57  ;;  %4459 = vmatpush3.msra.mxu1 %v3025_v42  ;;  %v4759_v57 = vld [vmem:[#allocation7 + $0xc0] sm:$0xff]  }
0x17d1   : > { %3370 = vmatprep.subr.bf16.mxu1 %v4737_v24  ;;  %v4760_v42 = vld [vmem:[#allocation7 + $0x80] sm:$0xff]  }
0x17d3   : > { %v3106_v11 = vpop.permute.xlu0 %3105 }
0x17da   : > { %v4830_v47 = vpop.eup %4829 }
0x17db   : > { %v3019_v59 = vsel %vm1071_vm2, %v4830_v47, 0.0 }
0x17dc   : > { %3020 = vadd.xlane.f32.xlu1 %v3019_v59  ;;  %v4762_v59 = vld [vmem:[#allocation7 + $0x88] sm:$0xff]  }
0x17ed   : > { %3101 = vrot.lane.b32.xlu1 %v2766_v28, %s5046_s17  ;;  %v4743_v28 = vld [vmem:[#allocation5 + $0xa4] ss:$8 sps:$4 sm:$0xff]   ;;  %s4190_s17 = sshll.u32 %s5174_s2, 4  ;;  %s4955_s2 = scalar_lea.vmem %s5727_s21, 16 }
0x17ee   : > { %s5725_s0 = scalar_lea.hbm %s5841_s22, %s4190_s17  ;;  %p4956_p2 = scmp.ne.s32.totalorder %s5727_s21, %s4955_s2 }
0x17f0   : > { %p4957_p4 = pnand %p4956_p2, %p5843_p3 }
0x17f2   : > { %p4958_p7 = pneg %p4957_p4 }
0x1869   : > { %v3021_v62 = vpop.xlane.xlu1 %3020 }
0x186a   : > { %4831 = vrcp.f32 %v3021_v62  ;;  %v4763_v62 = vld [vmem:[#allocation7 + $0xd0] sm:$0xff]  }
0x186d   : > { %v3102_v2 = vpop.permute.xlu1 %3101 }
0x186e   : > { %v3112_v10 = vsel %vm994_vm1, %v5558_v9, %v3102_v2  ;;  %v4735_v9 = vld [vmem:[#allocation5 + $0x80] ss:$8 sps:$4 sm:$0xff]  }
0x186f   : > { %v3113_v12 = vsel %vm1665_vm3, %v3112_v10, %v3106_v11 }
0x1874   : > { %v4832_v60 = vpop.eup %4831 }
0x1875   : > { %v3023_v63 = vmul.f32 %v4832_v60, %v4830_v47  ;;  %v4761_v47 = vld [vmem:[#allocation7 + $0xc8] sm:$0xff]   ;;  %v4764_v60 = vld [vmem:[#allocation7 + $0x90] sm:$0xff]  }
0x1877   : > { %4461 = vmatmul.mubr.msk.f32.vlgmr.msra.gmra.mrb[40].mxu1 %vm1071_vm2, %v3023_v63  ;;  %v4765_v63 = vld [vmem:[#allocation7 + $0xd8] sm:$0xff]  }
0x1878   : > { %3402 = vmatprep.mubr.bf16.mxu1 %v5042_v25  ;;  %v4730_v25 = vld [vmem:[%s5773_s6 + $0x58] sm:$0xff]   ;;  %3371 = vmatpush1.bf16.msra.mxu1 %v4735_v9 }
0x1879   : > { %4470 = vmatpush3.bf16.msra.mxu0 %v4730_v25  ;;  %3372 = vmatprep.subr.bf16.mxu1 %v4740_v26  ;;  %v4769_v25 = vld [vmem:[#allocation7 + $0xe8] sm:$0xff]  }
0x187a   : > { %4471 = vmatprep.subr.bf16.mxu0 %v5041_v3 }
0x187c   : > { %3373 = vmatpush1.bf16.msra.mxu1 %v4738_v27 }
0x187d   : > { %4472 = vmatpush3.bf16.msra.mxu0 %v4731_v4  ;;  %3374 = vmatprep.subr.bf16.mxu1 %v4743_v28  ;;  %v4770_v4 = vld [vmem:[#allocation7 + $0xa8] sm:$0xff]  }
0x187e   : > { %4473 = vmatprep.subr.bf16.mxu0 %v5041_v3 }
0x1880   : > { %3375 = vmatpush1.bf16.msra.mxu1 %v4741_v29 }
0x1881   : > { %4474 = vmatpush3.bf16.msra.mxu0 %v4732_v5  ;;  %3376 = vmatprep.subr.bf16.mxu1 %v4746_v33  ;;  %v4771_v5 = vld [vmem:[#allocation7 + $0xf0] sm:$0xff]  }
0x1882   : > { %4475 = vmatprep.subr.bf16.mxu0 %v5041_v3 }
0x1885   : > { %4476 = vmatpush3.bf16.msra.mxu0 %v4733_v61  ;;  %v4772_v61 = vld [vmem:[#allocation7 + $0xb0] sm:$0xff]  }
0x1886   : > { %4477 = vmatprep.subr.bf16.mxu0 %v5041_v3 }
0x1889   : > { %4478 = vmatpush3.bf16.msra.mxu0 %v4734_v6  ;;  %v4773_v6 = vld [vmem:[#allocation7 + $0xf8] sm:$0xff]  }
0x188a   : > { %4283 = vmatprep.subr.bf16.mxu0 %v4759_v57  ;;  %v4781_v57 = vld [vmem:[%s5783_s16 + $0x30] sm:$0xff]  }
0x194a   : > { %v3096_v7 = vpop.f32.mrb[40].mxu1 }
0x194b   : > { %3109 = vrot.lane.b32.xlu1 %v3096_v7, %s5044_s28  ;;  %v4462_v8 = vpop.f32.mrb[41].mxu1  ;;  %v4774_v7 = vld [vmem:[#allocation7 + $0xb8] sm:$0xff]  }
0x194c   : > { %v4135_v8 = vld [vmem:[%s5778_s11 + $0x2] sm:$0x3] }
0x194d   : > { %v3283_v2 = vrot.slane %v4135_v8, %v5351_v43  ;;  %v3287_v10 = vrot.slane %v4135_v8, %v5357_v45  ;;  %v4787_v8 = vld [vmem:[#allocation8 + $0x20] sm:$0xff]  }
0x19bd   : > { %v3110_v13 = vpop.permute.xlu1 %3109 }
0x19be   : > { %v3114_v15 = vsel %vm1667_vm4, %v3113_v12, %v3110_v13 }
0x19bf   : > { %v3115_v16 = vpack.c.bf16 %v3114_v15, %v3114_v15 }
0x19c1   : > { %4480 = vmatmul.mubr.bf16.vlgmr.msra.gmra.mrb[20].mxu0 %v3115_v16 }
0x19c2   : > { %4284 = vmatpush3.bf16.msra.mxu0 %v4760_v42  ;;  %v4782_v42 = vld [vmem:[%s5783_s16 + $0x38] sm:$0xff]  }
0x19c3   : > { %4285 = vmatprep.subr.bf16.mxu0 %v4761_v47  ;;  %v4783_v47 = vld [vmem:[#allocation8] sm:$0xff]  }
0x19c6   : > { %4286 = vmatpush3.bf16.msra.mxu0 %v4762_v59  ;;  %v4784_v59 = vld [vmem:[#allocation8 + $0x8] sm:$0xff]  }
0x19c7   : > { %4287 = vmatprep.subr.bf16.mxu0 %v4763_v62  ;;  %v4785_v62 = vld [vmem:[#allocation8 + $0x10] sm:$0xff]  }
0x19ca   : > { %4288 = vmatpush3.bf16.msra.mxu0 %v4764_v60  ;;  %v4786_v60 = vld [vmem:[#allocation8 + $0x18] sm:$0xff]  }
0x19cb   : > { %4289 = vmatprep.subr.bf16.mxu0 %v4765_v63 }
0x19ce   : > { %4290 = vmatpush3.bf16.msra.mxu0 %v4766_v58 }
0x19cf   : > { %4291 = vmatprep.subr.bf16.mxu0 %v4767_v0 }
0x19d2   : > { %4292 = vmatpush3.bf16.msra.mxu0 %v4768_v1 }
0x19d3   : > { %4293 = vmatprep.subr.bf16.mxu0 %v4769_v25  ;;  %v4172_v25 = vld [vmem:[%s5781_s14 + $0x1] ss:$0 sm:$0xff] }
0x19d6   : > { %4294 = vmatpush3.bf16.msra.mxu0 %v4770_v4 }
0x19d7   : > { %4295 = vmatprep.subr.bf16.mxu0 %v4771_v5  ;;  %v4173_v5 = vld [vmem:[%s5782_s15 + $0x1] ss:$0 sm:$0xff] }
0x19da   : > { %4296 = vmatpush3.bf16.msra.mxu0 %v4772_v61 }
0x19db   : > { %4297 = vmatprep.subr.bf16.mxu0 %v4773_v6 }
0x19de   : > { %4298 = vmatpush3.bf16.msra.mxu0 %v4774_v7 }
0x19df   : > { %4503 = vmatprep.subr.bf16.mxu0 %v5041_v3 }
0x1a94   : > { %v3223_v18 = vpop.f32.mrb[20].mxu0 }
0x1a95   : > { %v3224_v19 = vadd.f32 %v4122_v17, %v3223_v18  ;;  %v4481_v20 = vpop.f32.mrb[21].mxu0 }
0x1a96   : > { %v3226_v21 = vpop.f32.mrb[22].mxu0 }
0x1a97   : > { %v4482_v22 = vpop.f32.mrb[23].mxu0  ;;  %v3229_v23 = vadd.f32 %v3224_v19, %v5513_v37  ;;  %v4744_v37 = vld [vmem:[#allocation5 + $0xb0] ss:$8 sps:$4 sm:$0xff]  }
0x1a98   : > { %3377 = vmatpush1.bf16.msra.mxu1 %v4744_v37 }
0x1a99   : > { %3234 = vadd.xlane.f32.xlu0 %v3229_v23  ;;  %3378 = vmatprep.subr.bf16.mxu1 %v4749_v34 }
0x1a9c   : > { %3379 = vmatpush1.bf16.msra.mxu1 %v4747_v35  ;;  %v4153_v35 = vld [vmem:[%s5780_s13 + $0x1] ss:$0 sm:$0xff] }
0x1a9d   : > { %3380 = vmatprep.subr.bf16.mxu1 %v4752_v36 }
0x1aa0   : > { %3381 = vmatpush1.bf16.msra.mxu1 %v4750_v38 }
0x1aa1   : > { %3382 = vmatprep.subr.bf16.mxu1 %v4755_v40 }
0x1aa4   : > { %3383 = vmatpush1.bf16.msra.mxu1 %v4753_v41 }
0x1aa5   : > { %3384 = vmatprep.subr.bf16.mxu1 %v4758_v44 }
0x1aa8   : > { %3385 = vmatpush1.bf16.msra.mxu1 %v4756_v46 }
0x1aa9   : > { %4483 = vmatprep.subr.bf16.mxu1 %v5041_v3 }
0x1b26   : > { %v3235_v30 = vpop.xlane.xlu0 %3234 }
0x1b27   : > { %v3236_v31 = vmul.f32 0.0078125, %v3235_v30 }
0x1b29   : > { %v3237_v32 = vsub.f32 %v3229_v23, %v3236_v31 }
0x1b2b   : > { %v3238_v14 = vmul.f32 %v3237_v32, %v3237_v32 }
0x1b2d   : > { %3239 = vadd.xlane.f32.xlu1 %v3238_v14 }
0x1bba   : > { %v3240_v39 = vpop.xlane.xlu1 %3239 }
0x1bbb   : > { %v3241_v48 = vmul.f32 0.0078125, %v3240_v39  ;;  %v4775_v39 = vld [vmem:[%s5783_s16] sm:$0xff]  }
0x1bbd   : > { %v3242_v49 = vadd.f32 1e-12, %v3241_v48  ;;  %v4776_v48 = vld [vmem:[%s5783_s16 + $0x8] sm:$0xff]  }
0x1bbf   : > { %4833 = vrsqrt.f32 %v3242_v49 }
0x1bc9   : > { %v4834_v50 = vpop.eup %4833 }
0x1bca   : > { %v3244_v52 = vmul.f32 %v4834_v50, %v3237_v32 }
0x1bcc   : > { %v3251_v54 = vmul.f32 %v4133_v51, %v3244_v52 }
0x1bce   : > { %v5652_v55 = vadd.f32 %v4134_v53, %v3251_v54  ;;  %v4777_v53 = vld [vmem:[%s5783_s16 + $0x10] sm:$0xff]   ;;  %v4778_v54 = vld [vmem:[%s5783_s16 + $0x18] sm:$0xff]  }
0x1bd0   : > { %v3259_v56 = vpack.c.bf16 %v5652_v55, %v5652_v55 }
0x1bd2   : > { %3403 = vmatmul.mubr.bf16.vlgmr.msra.gmra.mrb[44].mxu1 %v3259_v56  ;;  %v4780_v56 = vld [vmem:[%s5783_s16 + $0x28] sm:$0xff]  }
0x1bd3   : > { %4499 = vmatprep.mubr.msk.bf16.mxu1 %vm5043_vm0, %v5041_v3  ;;  %4484 = vmatpush3.bf16.msra.mxu1 %v4775_v39 }
0x1bd4   : > { %4485 = vmatprep.subr.bf16.mxu1 %v5041_v3 }
0x1bd7   : > { %4486 = vmatpush3.bf16.msra.mxu1 %v4776_v48 }
0x1bd8   : > { %4487 = vmatprep.subr.bf16.mxu1 %v5041_v3 }
0x1bdb   : > { %4488 = vmatpush3.bf16.msra.mxu1 %v4777_v53 }
0x1bdc   : > { %4489 = vmatprep.subr.bf16.mxu1 %v5041_v3 }
0x1bdf   : > { %4490 = vmatpush3.bf16.msra.mxu1 %v4778_v54 }
0x1be0   : > { %4491 = vmatprep.subr.bf16.mxu1 %v5041_v3 }
0x1ca5   : > { %v3404_v11 = vpop.f32.mrb[44].mxu1 }
0x1ca6   : > { %v3405_v12 = vadd.f32 %v3404_v11, %v3283_v2  ;;  %v3406_v13 = vpop.f32.mrb[45].mxu1  ;;  %v4788_v2 = vld [vmem:[#allocation8 + $0x28] sm:$0xff]   ;;  %v4790_v11 = vld [vmem:[#allocation8 + $0x38] sm:$0xff]  }
0x1ca7   : > { %v3407_v15 = vadd.f32 %v3406_v13, %v3287_v10  ;;  %v3408_v16 = vpop.f32.mrb[46].mxu1  ;;  %v4789_v10 = vld [vmem:[#allocation8 + $0x30] sm:$0xff]  }
0x1ca8   : > { %v3411_v17 = vmul.f32 %v3405_v12, %v3405_v12  ;;  %v3409_v18 = vpop.f32.mrb[47].mxu1 }
0x1ca9   : > { %v3412_v19 = vmul.f32 %v3407_v15, %v3407_v15 }
0x1caa   : > { %v3413_v20 = vmul.f32 %v3411_v17, %v3405_v12 }
0x1cab   : > { %v3414_v21 = vmul.f32 %v3412_v19, %v3407_v15 }
0x1cac   : > { %v3415_v22 = vmul.f32 0.044715, %v3413_v20 }
0x1cad   : > { %v3416_v23 = vmul.f32 0.044715, %v3414_v21 }
0x1cae   : > { %v3417_v9 = vadd.f32 %v3415_v22, %v3405_v12 }
0x1caf   : > { %v3418_v24 = vadd.f32 %v3416_v23, %v3407_v15 }
0x1cb0   : > { %v3419_v26 = vmul.f32 0.7978846, %v3417_v9 }
0x1cb1   : > { %v3420_v27 = vmul.f32 0.7978846, %v3418_v24 }
0x1cb2   : > { %4835 = vtanh.f32 %v3419_v26 }
0x1cb3   : > { %4837 = vtanh.f32 %v3420_v27 }
0x1cbc   : > { %v4836_v43 = vpop.eup %4835 }
0x1cbd   : > { %v4838_v45 = vpop.eup %4837  ;;  %v3423_v28 = vadd.f32 1.0, %v4836_v43 }
0x1cbe   : > { %v3424_v29 = vadd.f32 1.0, %v4838_v45 }
0x1cbf   : > { %v3425_v30 = vmul.f32 0.5, %v3423_v28 }
0x1cc0   : > { %v3426_v31 = vmul.f32 0.5, %v3424_v29 }
0x1cc1   : > { %v3427_v32 = vmul.f32 %v3425_v30, %v3405_v12  ;;  %v3655_v12 = vld [vmem:[%s5838_s24] sm:$0x1]  ;;  %s4961_s24 = scalar_lea.vmem %s4960_s1, 32 }
0x1cc2   : > { %v3428_v14 = vmul.f32 %v3426_v31, %v3407_v15  ;;  %p4963_p11 = scmp.lt.s32.totalorder %s4961_s24, %s4955_s2 }
0x1cc3   : > { %v3429_v37 = vpack.c.bf16 %v3427_v32, %v3427_v32 }
0x1cc4   : > { %v3430_v33 = vpack.c.bf16 %v3428_v14, %v3428_v14  ;;  %p4964_p13 = por %p4963_p11, %p4962_p8 }
0x1cc6   : > { %3600 = vmatprep.mubr.bf16.mxu0 %v3430_v33  ;;  %p4965_p5 = pnand %p4964_p13, %p4958_p7 }
0x1cc7   : > { %3601 = vmatmul.mubr.bf16.vlgmr.msra.gmra.mrb[24].mxu0 %v3429_v37 }
0x1cc8   : > { %4519 = vmatprep.mubr.msk.bf16.mxu0 %vm5043_vm0, %v5041_v3  ;;  %4504 = vmatpush3.bf16.msra.mxu0 %v4783_v47 }
0x1cc9   : > { %4505 = vmatprep.subr.bf16.mxu0 %v5041_v3 }
0x1ccc   : > { %4506 = vmatpush3.bf16.msra.mxu0 %v4784_v59 }
0x1ccd   : > { %4507 = vmatprep.subr.bf16.mxu0 %v5041_v3 }
0x1cd0   : > { %4508 = vmatpush3.bf16.msra.mxu0 %v4785_v62 }
0x1cd1   : > { %4509 = vmatprep.subr.bf16.mxu0 %v5041_v3 }
0x1cd4   : > { %4510 = vmatpush3.bf16.msra.mxu0 %v4786_v60 }
0x1cd5   : > { %4511 = vmatprep.subr.bf16.mxu0 %v5041_v3 }
0x1cd8   : > { %4512 = vmatpush3.bf16.msra.mxu0 %v4787_v8 }
0x1cd9   : > { %4513 = vmatprep.subr.bf16.mxu0 %v5041_v3 }
0x1cdc   : > { %4514 = vmatpush3.bf16.msra.mxu0 %v4788_v2 }
0x1cdd   : > { %4515 = vmatprep.subr.bf16.mxu0 %v5041_v3 }
0x1ce0   : > { %4516 = vmatpush3.bf16.msra.mxu0 %v4789_v10 }
0x1ce1   : > { %4517 = vmatprep.subr.bf16.mxu0 %v5041_v3 }
0x1ce4   : > { %4518 = vmatpush3.bf16.msra.mxu0 %v4790_v11 }
0x1d9a   : > { %v4299_v34 = vpop.f32.mrb[24].mxu0 }
0x1d9b   : > { %v4300_v36 = vpop.f32.mrb[25].mxu0 }
0x1d9c   : > { %v4301_v38 = vadd.f32 %v4300_v36, %v4299_v34  ;;  %v4302_v40 = vpop.f32.mrb[26].mxu0 }
0x1d9d   : > { %v4303_v41 = vpop.f32.mrb[27].mxu0 }
0x1d9e   : > { %v3603_v44 = vadd.f32 %v4301_v38, %v4153_v35 }
0x1da0   : > { %v3608_v46 = vadd.f32 %v3603_v44, %v5652_v55  ;;  %v4779_v55 = vld [vmem:[%s5783_s16 + $0x20] sm:$0xff]  }
0x1da1   : > { %4492 = vmatpush3.bf16.msra.mxu1 %v4779_v55 }
0x1da2   : > { %3613 = vadd.xlane.f32.xlu0 %v3608_v46  ;;  %4493 = vmatprep.subr.bf16.mxu1 %v5041_v3 }
0x1da5   : > { %4494 = vmatpush3.bf16.msra.mxu1 %v4780_v56 }
0x1da6   : > { %4495 = vmatprep.subr.bf16.mxu1 %v5041_v3 }
0x1da9   : > { %4496 = vmatpush3.bf16.msra.mxu1 %v4781_v57 }
0x1daa   : > { %4497 = vmatprep.subr.bf16.mxu1 %v5041_v3  ;;  %v3762_v3 = vld [vmem:[%s5839_s29] sm:$0x1] }
0x1dad   : > { %4498 = vmatpush3.bf16.msra.mxu1 %v4782_v42 }
0x1e2f   : > { %v3614_v49 = vpop.xlane.xlu0 %3613 }
0x1e30   : > { %v3615_v50 = vmul.f32 0.0078125, %v3614_v49 }
0x1e32   : > { %v3616_v51 = vsub.f32 %v3608_v46, %v3615_v50 }
0x1e34   : > { %v3617_v52 = vmul.f32 %v3616_v51, %v3616_v51 }
0x1e36   : > { %3618 = vadd.xlane.f32.xlu0 %v3617_v52 }
0x1ec3   : > { %v3619_v63 = vpop.xlane.xlu0 %3618 }
0x1ec4   : > { %v3620_v58 = vmul.f32 0.0078125, %v3619_v63 }
0x1ec6   : > { %v3621_v0 = vadd.f32 1e-12, %v3620_v58 }
0x1ec8   : > { %4839 = vrsqrt.f32 %v3621_v0 }
0x1ed2   : > { %v4840_v1 = vpop.eup %4839 }
0x1ed3   : > { %v3623_v4 = vmul.f32 %v4840_v1, %v3616_v51 }
0x1ed5   : > { %v3630_v61 = vmul.f32 %v4172_v25, %v3623_v4 }
0x1ed7   : > { %v3637_v6 = vadd.f32 %v4173_v5, %v3630_v61 }
0x1ed9   : > { %v3638_v7 = vpack.c.bf16 %v3637_v6, %v3637_v6 }
0x1edb   : > { %4500 = vmatmul.mubr.bf16.vlgmr.msra.gmra.mrb[48].mxu1 %v3638_v7 }
0x1fae   : > { %v3738_v13 = vpop.f32.mrb[48].mxu1 }
0x1faf   : > { %v3739_v15 = vadd.f32 %v3738_v13, %v3655_v12  ;;  %v4501_v16 = vpop.f32.mrb[49].mxu1 }
0x1fb0   : > { %v3741_v17 = vpop.f32.mrb[50].mxu1 }
0x1fb1   : > { %4841 = vtanh.f32 %v3739_v15  ;;  %v4502_v18 = vpop.f32.mrb[51].mxu1 }
0x1fbb   : > { %v4842_v19 = vpop.eup %4841 }
0x1fbc   : > { %v3745_v20 = vpack.c.bf16 %v4842_v19, %v4842_v19 }
0x1fbe   : > { %4520 = vmatmul.mubr.bf16.vlgmr.msra.gmra.mrb[28].mxu0 %v3745_v20 }
0x2091   : > { %v3845_v21 = vpop.f32.mrb[28].mxu0 }
0x2092   : > { %v3846_v22 = vadd.f32 %v3845_v21, %v3762_v3  ;;  %v4521_v23 = vpop.f32.mrb[29].mxu0 }
0x2093   : > { %v3848_v9 = vpop.f32.mrb[30].mxu0 }
0x2094   : > { %3851 = vst [vmem:[%s689_s23] sm:$0x1] %v3846_v22  ;;  %v4522_v24 = vpop.f32.mrb[31].mxu0 }
0x2095   : > { %4968 = shalt.err (!%p4965_p5)
}
0x2096   : > { %s4969_s30 = scalar_lea.hbm %s5725_s0, 16  ;;  %s4973_s29 = scalar_lea.hbm %s5842_s25, 32 }
0x2097   : > { %p4970_p0 = scmp.ne.s32.totalorder %s5725_s0, %s4969_s30  ;;  %p4974_p10 = scmp.lt.u32.totalorder %s5725_s0, %s5842_s25 }
0x2098   : > { %p4975_p12 = scmp.lt.u32.totalorder %s4973_s29, %s4969_s30  ;;  %p4977_p2 = scmp.lt.u32.totalorder %s4969_s30, %s5725_s0 }
0x2099   : > { %p4971_p6 = pnand %p4970_p0, %p5843_p3 }
0x209a   : > { %p4976_p1 = por %p4975_p12, %p4974_p10 }
0x209b   : > { %p4972_p9 = pneg %p4971_p6 }
0x209c   : > { %p4978_p4 = por %p4977_p2, %p4976_p1 }
0x209e   : > { %p4979_p7 = pnand %p4978_p4, %p4972_p9 }
0x20a0   : > { %4982 = shalt.err (!%p4979_p7)
}
0x20a1   : > { %4539 = dma.vmem_to_hbm [thread:$0]  (%p5843_p3), %s5727_s21, 16, %s5725_s0, %s3853_s19  }
0x20a2 PF: > { %s5844_s27 = sld [smem:[#allocation18_spill]]  ;;  %s5845_s10 = sld [smem:[#allocation15_spill]] }
0x20a3   : > { %s5846_s22 = sld [smem:[#allocation22_spill]] }
0x20a8   : > { %p4566_p8 = scmp.ge.s32.totalorder %s5844_s27, 2  ;;  %s3877_s2 = sand.u32 1, %s5845_s10  }
0x20a9   : > { %p5847_p11 = scmp.ne.s32.totalorder %s5846_s22, 0  ;;  %s3878_s4 = scalar_lea.sflag [#allocation4], %s3877_s2 }
0x20ab   : > { %p4555_p13 = pnand %p4566_p8, %p5847_p11 }
0x20ad   : > { %5012 = dma.done.wait (!%p4555_p13), %s3878_s4, 16  }
0x20ae   : > { %5014 = vsyncadd (!%p4555_p13), %s3878_s4, 4294967280  ;;  %s5848_s24 = sld [smem:[#allocation19_spill]]  ;;  %s5849_s1 = sld [smem:[#allocation16_spill]] }
0x20af   : > { %s5850_s22 = sld [smem:[#allocation17_spill]]  ;;  %s5851_s23 = sld [smem:[#allocation20_spill]] }
0x20b4   : > { %p33_p5 = scmp.ge.s32.totalorder %s5848_s24, 4  }
0x20b6   :  { %35 = sbr.rel (!%p33_p5) target bundleno = 16 (0x10), region = 167 }
0x20bd   :  { %3882 = vsyncpa [#allocation3], 1 }
0x20be   :  { %3884 = vsyncpa [#allocation3 + $0x1], 1 }
0x20bf   :  { %3885 = vsyncpa [#allocation6], 1 }
0x20c0   :  { %3886 = vsyncpa [#allocation9], 1 }
0x20c1   :  { %3887 = vsyncpa [#allocation4], 1 }
0x20c2   :  { %3889 = vsyncpa [#allocation4 + $0x1], 1 }

</bundles_post_ra>
